<compile_context>
chip_gen: v6e
topology: v6e:2x2x1
jax: 0.10.0
libtpu: 0.0.40
codegen_flags: <defaults>
</compile_context>

<pallas_src>
import functools

import jax
import jax.numpy as jnp
import numpy as np
from jax.experimental import pallas as pl
from jax.experimental.pallas import tpu as pltpu

_BN_EPS = 1e-5


def _sep_conv3x3_kernel(w_ref, x_ref, sd_ref, su_ref, dwt1_ref, bpw1_ref,
                        dwt2_ref, bpw2_ref, o_ref, *, C, W):
    """SepConv3x3 (stride 1) + arch-weight scale in lane-dense (N*H, W*C) layout."""
    NH, WC = o_ref.shape
    inv_count = 1.0 / float(NH * W)          # BN reduction count = N*H*W
    wgt = w_ref[0]                           # scalar architecture weight (SMEM)

    s_down = sd_ref[...]                     # (NH, NH): row r <- row r-1, zero at h==0 / batch edge
    s_up = su_ref[...]                       # (NH, NH): row r <- row r+1, zero at h==H-1

    def depthwise3x3(h, dwt):
        """9-tap depthwise conv.

        dy shifts: tiny shift-matrix matmuls (boundary + batch-edge zero padding baked in).
        dx shifts: pltpu.roll by +-C lanes; the W-boundary zero padding is folded
        into the pre-masked tiled taps, so no per-tap masks are needed.
        """
        rows = (
            jnp.dot(s_down, h, preferred_element_type=jnp.float32),   # reads h-1
            h,                                                        # reads h
            jnp.dot(s_up, h, preferred_element_type=jnp.float32),     # reads h+1
        )
        acc = None
        for ky in range(3):
            base = rows[ky]
            for kx in range(3):
                shift = ((1 - kx) * C) % WC
                v = base if shift == 0 else pltpu.roll(base, shift, axis=1)
                tap = 3 * ky + kx
                term = v * dwt[tap:tap + 1, :]          # (1, WC) broadcast over rows
                acc = term if acc is None else acc + term   # first tap seeds acc (no zeros)
        return acc

    def fold_groups(v):
        """Circular all-reduce of the W channel-groups along the lane axis."""
        if (W & (W - 1)) == 0:               # power-of-two W: log-step fold
            step = C
            while step < WC:
                v = v + pltpu.roll(v, step, axis=1)
                step *= 2
            return v
        out = v                              # generic fallback
        for k in range(1, W):
            out = out + pltpu.roll(v, (k * C) % WC, axis=1)
        return out

    def batchnorm_stats(y):
        """Single-pass per-channel mean / var, broadcast back to the (1, W*C) lane layout."""
        ssum = fold_groups(jnp.sum(y, axis=0, keepdims=True))
        ssq = fold_groups(jnp.sum(y * y, axis=0, keepdims=True))
        mean = ssum * inv_count
        var = ssq * inv_count - mean * mean  # biased, training-mode BN
        return mean, var

    # ---- block 1: ReLU -> depthwise 3x3 -> 1x1 conv (block-diag matmul) -> BN ----
    xr = jnp.maximum(x_ref[...], 0.0)
    acc1 = depthwise3x3(xr, dwt1_ref[...])
    y = jnp.dot(acc1, bpw1_ref[...], preferred_element_type=jnp.float32)
    mean1, var1 = batchnorm_stats(y)
    y = (y - mean1) * jax.lax.rsqrt(var1 + _BN_EPS)

    # ---- block 2: ReLU -> depthwise 3x3 -> 1x1 conv -> BN (arch weight folded in) ----
    yr = jnp.maximum(y, 0.0)
    acc2 = depthwise3x3(yr, dwt2_ref[...])
    z = jnp.dot(acc2, bpw2_ref[...], preferred_element_type=jnp.float32)
    mean2, var2 = batchnorm_stats(z)
    scale2 = wgt * jax.lax.rsqrt(var2 + _BN_EPS)     # SD_MixedOp: weights * CR_op(x)
    o_ref[...] = ((z - mean2) * scale2).astype(o_ref.dtype)


def sd_mixed_op_sep_conv3x3(x_nchw, weights, params):
    """weights * SepConv3x3(x).  x_nchw is NCHW like the PyTorch module."""
    dw1, pw1, dw2, pw2 = params
    N, C, H, W = x_nchw.shape
    NH, WC = N * H, W * C

    # NCHW -> NHWC -> lane-dense (N*H, W*C) slab (no padded copy).
    x = jnp.transpose(x_nchw, (0, 2, 3, 1)).astype(jnp.float32).reshape(NH, WC)

    # Depthwise taps tiled over W, with the W-boundary zero padding folded into the weights.
    lane_mask = np.ones((9, WC), np.float32)
    lane_mask[0::3, :C] = 0.0               # kx == 0 taps read w-1: invalid at w == 0
    lane_mask[2::3, (W - 1) * C:] = 0.0     # kx == 2 taps read w+1: invalid at w == W-1
    lane_mask = jnp.asarray(lane_mask)

    def tile_taps(dw):
        return jnp.tile(dw.reshape(9, C).astype(jnp.float32), (1, W)) * lane_mask

    # Row-shift matrices encode the H-boundary (and batch-boundary) zero padding.
    sd = np.zeros((NH, NH), np.float32)
    su = np.zeros((NH, NH), np.float32)
    for r in range(NH):
        if r % H != 0:
            sd[r, r - 1] = 1.0
        if r % H != H - 1:
            su[r, r + 1] = 1.0
    sd, su = jnp.asarray(sd), jnp.asarray(su)

    # 1x1 conv as a block-diagonal (W*C, W*C) matmul: stays in the fused layout, no reshapes.
    eye_w = jnp.eye(W, dtype=jnp.float32)
    bpw1 = jnp.kron(eye_w, pw1.astype(jnp.float32))
    bpw2 = jnp.kron(eye_w, pw2.astype(jnp.float32))

    w_scalar = jnp.reshape(weights, (1,)).astype(jnp.float32)

    kernel = functools.partial(_sep_conv3x3_kernel, C=C, W=W)
    vmem = pl.BlockSpec(memory_space=pltpu.MemorySpace.VMEM)
    out = pl.pallas_call(
        kernel,
        out_shape=jax.ShapeDtypeStruct((NH, WC), jnp.float32),
        in_specs=[
            pl.BlockSpec(memory_space=pltpu.MemorySpace.SMEM),  # arch weight scalar
            vmem,   # x (N*H, W*C)
            vmem,   # S_down (N*H, N*H)
            vmem,   # S_up
            vmem,   # dw1 tiled taps (9, W*C)
            vmem,   # block-diag pw1 (W*C, W*C)
            vmem,   # dw2 tiled taps
            vmem,   # block-diag pw2
        ],
        out_specs=vmem,
    )(w_scalar, x, sd, su, tile_taps(dw1), bpw1, tile_taps(dw2), bpw2)

    return jnp.transpose(out.reshape(N, H, W, C), (0, 3, 1, 2))   # back to NCHW


def _ref_forward(x_nchw, weights, params):
    """Pure-JAX reference of weights * SepConv3x3(x) (training-mode BN, affine=False)."""
    dw1, pw1, dw2, pw2 = params
    x = jnp.transpose(x_nchw, (0, 2, 3, 1)).astype(jnp.float32)
    C = x.shape[-1]

    def block(h, dw, pw):
        h = jax.nn.relu(h)
        h = jax.lax.conv_general_dilated(
            h, dw.reshape(3, 3, 1, C), window_strides=(1, 1),
            padding=((1, 1), (1, 1)),
            dimension_numbers=('NHWC', 'HWIO', 'NHWC'),
            feature_group_count=C)
        h = jax.lax.conv_general_dilated(
            h, pw.reshape(1, 1, C, C), window_strides=(1, 1), padding='VALID',
            dimension_numbers=('NHWC', 'HWIO', 'NHWC'))
        mean = jnp.mean(h, axis=(0, 1, 2), keepdims=True)
        var = jnp.mean((h - mean) ** 2, axis=(0, 1, 2), keepdims=True)
        return (h - mean) / jnp.sqrt(var + _BN_EPS)

    y = block(x, dw1, pw1)
    y = block(y, dw2, pw2)
    return jnp.transpose(weights * y, (0, 3, 1, 2))


if __name__ == "__main__":
    key = jax.random.PRNGKey(0)
    k_x, k_w, k1, k2, k3, k4 = jax.random.split(key, 6)

    N, C, H, W = 2, 16, 16, 16            # SD_MixedOp(C=16, stride=1, op_id='sep_conv_3x3')
    x = jax.random.normal(k_x, (N, C, H, W), jnp.float32)          # NCHW, like PyTorch
    arch_weight = jax.random.uniform(k_w, (), jnp.float32)         # scalar mixing weight

    # deterministic synthetic parameters (SepConv has 2 depthwise + 2 pointwise convs, no bias)
    dw1 = 0.2 * jax.random.normal(k1, (3, 3, C), jnp.float32)      # depthwise taps [ky, kx, c]
    pw1 = 0.2 * jax.random.normal(k2, (C, C), jnp.float32)         # pointwise [c_in, c_out]
    dw2 = 0.2 * jax.random.normal(k3, (3, 3, C), jnp.float32)
    pw2 = 0.2 * jax.random.normal(k4, (C, C), jnp.float32)
    params = (dw1, pw1, dw2, pw2)

    out = sd_mixed_op_sep_conv3x3(x, arch_weight, params)
    out = jax.block_until_ready(out)

    ref = _ref_forward(x, arch_weight, params)
    np.testing.assert_allclose(np.asarray(out), np.asarray(ref), rtol=2e-2, atol=2e-2)
    assert out.shape == (N, C, H, W)
    print("KERNEL_OK")
</pallas_src>

<mosaic_0001>
module attributes {stable_mosaic.version = 11 : i64} {
  func.func @_sep_conv3x3_kernel(%arg0: memref<1xf32, #tpu.memory_space<smem>>, %arg1: memref<32x256xf32, #tpu.memory_space<vmem>>, %arg2: memref<32x32xf32, #tpu.memory_space<vmem>>, %arg3: memref<32x32xf32, #tpu.memory_space<vmem>>, %arg4: memref<9x256xf32, #tpu.memory_space<vmem>>, %arg5: memref<256x256xf32, #tpu.memory_space<vmem>>, %arg6: memref<9x256xf32, #tpu.memory_space<vmem>>, %arg7: memref<256x256xf32, #tpu.memory_space<vmem>>, %arg8: memref<32x256xf32, #tpu.memory_space<vmem>>) attributes {dimension_semantics = [], scalar_prefetch = 0 : i64, scratch_operands = 0 : i64, tpu.core_type = #tpu.core_type<tc>} {
    %c0 = arith.constant 0 : index
    %0 = memref.load %arg0[%c0] : memref<1xf32, #tpu.memory_space<smem>>
    %c0_0 = arith.constant 0 : index
    %c0_1 = arith.constant 0 : index
    %1 = vector.load %arg2[%c0_0, %c0_1] : memref<32x32xf32, #tpu.memory_space<vmem>>, vector<32x32xf32>
    %c0_2 = arith.constant 0 : index
    %c0_3 = arith.constant 0 : index
    %2 = vector.load %arg3[%c0_2, %c0_3] : memref<32x32xf32, #tpu.memory_space<vmem>>, vector<32x32xf32>
    %c0_4 = arith.constant 0 : index
    %c0_5 = arith.constant 0 : index
    %3 = vector.load %arg1[%c0_4, %c0_5] : memref<32x256xf32, #tpu.memory_space<vmem>>, vector<32x256xf32>
    %cst = arith.constant 0.000000e+00 : f32
    %4 = vector.broadcast %cst : f32 to vector<32x256xf32>
    %5 = arith.maximumf %3, %4 : vector<32x256xf32>
    %c0_6 = arith.constant 0 : index
    %c0_7 = arith.constant 0 : index
    %6 = vector.load %arg4[%c0_6, %c0_7] : memref<9x256xf32, #tpu.memory_space<vmem>>, vector<9x256xf32>
    %cst_8 = arith.constant dense<0.000000e+00> : vector<32x256xf32>
    %7 = tpu.matmul %1, %5, %cst_8 {dimension_numbers = #tpu.dot_dimension_numbers<[1], [0], [0], [1], [0, 0, 1, 1], [], []>} : vector<32x32xf32>, vector<32x256xf32>, vector<32x256xf32> -> vector<32x256xf32>
    %cst_9 = arith.constant dense<0.000000e+00> : vector<32x256xf32>
    %8 = tpu.matmul %2, %5, %cst_9 {dimension_numbers = #tpu.dot_dimension_numbers<[1], [0], [0], [1], [0, 0, 1, 1], [], []>} : vector<32x32xf32>, vector<32x256xf32>, vector<32x256xf32> -> vector<32x256xf32>
    %c16_i32 = arith.constant 16 : i32
    %9 = tpu.dynamic_rotate %7 by %c16_i32 dim 1 : vector<32x256xf32>, i32 -> vector<32x256xf32>
    %10 = vector.extract_strided_slice %6 {offsets = [0, 0], sizes = [1, 256], strides = [1, 1]} : vector<9x256xf32> to vector<1x256xf32>
    %11 = vector.broadcast %10 : vector<1x256xf32> to vector<32x256xf32>
    %12 = arith.mulf %9, %11 : vector<32x256xf32>
    %13 = vector.extract_strided_slice %6 {offsets = [1, 0], sizes = [1, 256], strides = [1, 1]} : vector<9x256xf32> to vector<1x256xf32>
    %14 = vector.broadcast %13 : vector<1x256xf32> to vector<32x256xf32>
    %15 = arith.mulf %7, %14 : vector<32x256xf32>
    %16 = arith.addf %12, %15 : vector<32x256xf32>
    %c240_i32 = arith.constant 240 : i32
    %17 = tpu.dynamic_rotate %7 by %c240_i32 dim 1 : vector<32x256xf32>, i32 -> vector<32x256xf32>
    %18 = vector.extract_strided_slice %6 {offsets = [2, 0], sizes = [1, 256], strides = [1, 1]} : vector<9x256xf32> to vector<1x256xf32>
    %19 = vector.broadcast %18 : vector<1x256xf32> to vector<32x256xf32>
    %20 = arith.mulf %17, %19 : vector<32x256xf32>
    %21 = arith.addf %16, %20 : vector<32x256xf32>
    %c16_i32_10 = arith.constant 16 : i32
    %22 = tpu.dynamic_rotate %5 by %c16_i32_10 dim 1 : vector<32x256xf32>, i32 -> vector<32x256xf32>
    %23 = vector.extract_strided_slice %6 {offsets = [3, 0], sizes = [1, 256], strides = [1, 1]} : vector<9x256xf32> to vector<1x256xf32>
    %24 = vector.broadcast %23 : vector<1x256xf32> to vector<32x256xf32>
    %25 = arith.mulf %22, %24 : vector<32x256xf32>
    %26 = arith.addf %21, %25 : vector<32x256xf32>
    %27 = vector.extract_strided_slice %6 {offsets = [4, 0], sizes = [1, 256], strides = [1, 1]} : vector<9x256xf32> to vector<1x256xf32>
    %28 = vector.broadcast %27 : vector<1x256xf32> to vector<32x256xf32>
    %29 = arith.mulf %5, %28 : vector<32x256xf32>
    %30 = arith.addf %26, %29 : vector<32x256xf32>
    %c240_i32_11 = arith.constant 240 : i32
    %31 = tpu.dynamic_rotate %5 by %c240_i32_11 dim 1 : vector<32x256xf32>, i32 -> vector<32x256xf32>
    %32 = vector.extract_strided_slice %6 {offsets = [5, 0], sizes = [1, 256], strides = [1, 1]} : vector<9x256xf32> to vector<1x256xf32>
    %33 = vector.broadcast %32 : vector<1x256xf32> to vector<32x256xf32>
    %34 = arith.mulf %31, %33 : vector<32x256xf32>
    %35 = arith.addf %30, %34 : vector<32x256xf32>
    %c16_i32_12 = arith.constant 16 : i32
    %36 = tpu.dynamic_rotate %8 by %c16_i32_12 dim 1 : vector<32x256xf32>, i32 -> vector<32x256xf32>
    %37 = vector.extract_strided_slice %6 {offsets = [6, 0], sizes = [1, 256], strides = [1, 1]} : vector<9x256xf32> to vector<1x256xf32>
    %38 = vector.broadcast %37 : vector<1x256xf32> to vector<32x256xf32>
    %39 = arith.mulf %36, %38 : vector<32x256xf32>
    %40 = arith.addf %35, %39 : vector<32x256xf32>
    %41 = vector.extract_strided_slice %6 {offsets = [7, 0], sizes = [1, 256], strides = [1, 1]} : vector<9x256xf32> to vector<1x256xf32>
    %42 = vector.broadcast %41 : vector<1x256xf32> to vector<32x256xf32>
    %43 = arith.mulf %8, %42 : vector<32x256xf32>
    %44 = arith.addf %40, %43 : vector<32x256xf32>
    %c240_i32_13 = arith.constant 240 : i32
    %45 = tpu.dynamic_rotate %8 by %c240_i32_13 dim 1 : vector<32x256xf32>, i32 -> vector<32x256xf32>
    %46 = vector.extract_strided_slice %6 {offsets = [8, 0], sizes = [1, 256], strides = [1, 1]} : vector<9x256xf32> to vector<1x256xf32>
    %47 = vector.broadcast %46 : vector<1x256xf32> to vector<32x256xf32>
    %48 = arith.mulf %45, %47 : vector<32x256xf32>
    %49 = arith.addf %44, %48 : vector<32x256xf32>
    %c0_14 = arith.constant 0 : index
    %c0_15 = arith.constant 0 : index
    %50 = vector.load %arg5[%c0_14, %c0_15] : memref<256x256xf32, #tpu.memory_space<vmem>>, vector<256x256xf32>
    %cst_16 = arith.constant dense<0.000000e+00> : vector<32x256xf32>
    %51 = tpu.matmul %49, %50, %cst_16 {dimension_numbers = #tpu.dot_dimension_numbers<[1], [0], [0], [1], [0, 0, 1, 1], [], []>} : vector<32x256xf32>, vector<256x256xf32>, vector<32x256xf32> -> vector<32x256xf32>
    %cst_17 = arith.constant dense<0.000000e+00> : vector<256xf32>
    %52 = vector.multi_reduction <add>, %51, %cst_17 [0] : vector<32x256xf32> to vector<256xf32>
    %53 = vector.shape_cast %52 : vector<256xf32> to vector<1x256xf32>
    %c16_i32_18 = arith.constant 16 : i32
    %54 = tpu.dynamic_rotate %53 by %c16_i32_18 dim 1 : vector<1x256xf32>, i32 -> vector<1x256xf32>
    %55 = arith.addf %53, %54 : vector<1x256xf32>
    %c32_i32 = arith.constant 32 : i32
    %56 = tpu.dynamic_rotate %55 by %c32_i32 dim 1 : vector<1x256xf32>, i32 -> vector<1x256xf32>
    %57 = arith.addf %55, %56 : vector<1x256xf32>
    %c64_i32 = arith.constant 64 : i32
    %58 = tpu.dynamic_rotate %57 by %c64_i32 dim 1 : vector<1x256xf32>, i32 -> vector<1x256xf32>
    %59 = arith.addf %57, %58 : vector<1x256xf32>
    %c128_i32 = arith.constant 128 : i32
    %60 = tpu.dynamic_rotate %59 by %c128_i32 dim 1 : vector<1x256xf32>, i32 -> vector<1x256xf32>
    %61 = arith.addf %59, %60 : vector<1x256xf32>
    %62 = arith.mulf %51, %51 : vector<32x256xf32>
    %cst_19 = arith.constant dense<0.000000e+00> : vector<256xf32>
    %63 = vector.multi_reduction <add>, %62, %cst_19 [0] : vector<32x256xf32> to vector<256xf32>
    %64 = vector.shape_cast %63 : vector<256xf32> to vector<1x256xf32>
    %c16_i32_20 = arith.constant 16 : i32
    %65 = tpu.dynamic_rotate %64 by %c16_i32_20 dim 1 : vector<1x256xf32>, i32 -> vector<1x256xf32>
    %66 = arith.addf %64, %65 : vector<1x256xf32>
    %c32_i32_21 = arith.constant 32 : i32
    %67 = tpu.dynamic_rotate %66 by %c32_i32_21 dim 1 : vector<1x256xf32>, i32 -> vector<1x256xf32>
    %68 = arith.addf %66, %67 : vector<1x256xf32>
    %c64_i32_22 = arith.constant 64 : i32
    %69 = tpu.dynamic_rotate %68 by %c64_i32_22 dim 1 : vector<1x256xf32>, i32 -> vector<1x256xf32>
    %70 = arith.addf %68, %69 : vector<1x256xf32>
    %c128_i32_23 = arith.constant 128 : i32
    %71 = tpu.dynamic_rotate %70 by %c128_i32_23 dim 1 : vector<1x256xf32>, i32 -> vector<1x256xf32>
    %72 = arith.addf %70, %71 : vector<1x256xf32>
    %cst_24 = arith.constant 0.001953125 : f32
    %73 = vector.broadcast %cst_24 : f32 to vector<1x256xf32>
    %74 = arith.mulf %61, %73 : vector<1x256xf32>
    %cst_25 = arith.constant 0.001953125 : f32
    %75 = vector.broadcast %cst_25 : f32 to vector<1x256xf32>
    %76 = arith.mulf %72, %75 : vector<1x256xf32>
    %77 = arith.mulf %74, %74 : vector<1x256xf32>
    %78 = arith.subf %76, %77 : vector<1x256xf32>
    %79 = vector.broadcast %74 : vector<1x256xf32> to vector<32x256xf32>
    %80 = arith.subf %51, %79 : vector<32x256xf32>
    %cst_26 = arith.constant 9.99999974E-6 : f32
    %81 = vector.broadcast %cst_26 : f32 to vector<1x256xf32>
    %82 = arith.addf %78, %81 : vector<1x256xf32>
    %83 = math.rsqrt %82 : vector<1x256xf32>
    %84 = vector.broadcast %83 : vector<1x256xf32> to vector<32x256xf32>
    %85 = arith.mulf %80, %84 : vector<32x256xf32>
    %cst_27 = arith.constant 0.000000e+00 : f32
    %86 = vector.broadcast %cst_27 : f32 to vector<32x256xf32>
    %87 = arith.maximumf %85, %86 : vector<32x256xf32>
    %c0_28 = arith.constant 0 : index
    %c0_29 = arith.constant 0 : index
    %88 = vector.load %arg6[%c0_28, %c0_29] : memref<9x256xf32, #tpu.memory_space<vmem>>, vector<9x256xf32>
    %cst_30 = arith.constant dense<0.000000e+00> : vector<32x256xf32>
    %89 = tpu.matmul %1, %87, %cst_30 {dimension_numbers = #tpu.dot_dimension_numbers<[1], [0], [0], [1], [0, 0, 1, 1], [], []>} : vector<32x32xf32>, vector<32x256xf32>, vector<32x256xf32> -> vector<32x256xf32>
    %cst_31 = arith.constant dense<0.000000e+00> : vector<32x256xf32>
    %90 = tpu.matmul %2, %87, %cst_31 {dimension_numbers = #tpu.dot_dimension_numbers<[1], [0], [0], [1], [0, 0, 1, 1], [], []>} : vector<32x32xf32>, vector<32x256xf32>, vector<32x256xf32> -> vector<32x256xf32>
    %c16_i32_32 = arith.constant 16 : i32
    %91 = tpu.dynamic_rotate %89 by %c16_i32_32 dim 1 : vector<32x256xf32>, i32 -> vector<32x256xf32>
    %92 = vector.extract_strided_slice %88 {offsets = [0, 0], sizes = [1, 256], strides = [1, 1]} : vector<9x256xf32> to vector<1x256xf32>
    %93 = vector.broadcast %92 : vector<1x256xf32> to vector<32x256xf32>
    %94 = arith.mulf %91, %93 : vector<32x256xf32>
    %95 = vector.extract_strided_slice %88 {offsets = [1, 0], sizes = [1, 256], strides = [1, 1]} : vector<9x256xf32> to vector<1x256xf32>
    %96 = vector.broadcast %95 : vector<1x256xf32> to vector<32x256xf32>
    %97 = arith.mulf %89, %96 : vector<32x256xf32>
    %98 = arith.addf %94, %97 : vector<32x256xf32>
    %c240_i32_33 = arith.constant 240 : i32
    %99 = tpu.dynamic_rotate %89 by %c240_i32_33 dim 1 : vector<32x256xf32>, i32 -> vector<32x256xf32>
    %100 = vector.extract_strided_slice %88 {offsets = [2, 0], sizes = [1, 256], strides = [1, 1]} : vector<9x256xf32> to vector<1x256xf32>
    %101 = vector.broadcast %100 : vector<1x256xf32> to vector<32x256xf32>
    %102 = arith.mulf %99, %101 : vector<32x256xf32>
    %103 = arith.addf %98, %102 : vector<32x256xf32>
    %c16_i32_34 = arith.constant 16 : i32
    %104 = tpu.dynamic_rotate %87 by %c16_i32_34 dim 1 : vector<32x256xf32>, i32 -> vector<32x256xf32>
    %105 = vector.extract_strided_slice %88 {offsets = [3, 0], sizes = [1, 256], strides = [1, 1]} : vector<9x256xf32> to vector<1x256xf32>
    %106 = vector.broadcast %105 : vector<1x256xf32> to vector<32x256xf32>
    %107 = arith.mulf %104, %106 : vector<32x256xf32>
    %108 = arith.addf %103, %107 : vector<32x256xf32>
    %109 = vector.extract_strided_slice %88 {offsets = [4, 0], sizes = [1, 256], strides = [1, 1]} : vector<9x256xf32> to vector<1x256xf32>
    %110 = vector.broadcast %109 : vector<1x256xf32> to vector<32x256xf32>
    %111 = arith.mulf %87, %110 : vector<32x256xf32>
    %112 = arith.addf %108, %111 : vector<32x256xf32>
    %c240_i32_35 = arith.constant 240 : i32
    %113 = tpu.dynamic_rotate %87 by %c240_i32_35 dim 1 : vector<32x256xf32>, i32 -> vector<32x256xf32>
    %114 = vector.extract_strided_slice %88 {offsets = [5, 0], sizes = [1, 256], strides = [1, 1]} : vector<9x256xf32> to vector<1x256xf32>
    %115 = vector.broadcast %114 : vector<1x256xf32> to vector<32x256xf32>
    %116 = arith.mulf %113, %115 : vector<32x256xf32>
    %117 = arith.addf %112, %116 : vector<32x256xf32>
    %c16_i32_36 = arith.constant 16 : i32
    %118 = tpu.dynamic_rotate %90 by %c16_i32_36 dim 1 : vector<32x256xf32>, i32 -> vector<32x256xf32>
    %119 = vector.extract_strided_slice %88 {offsets = [6, 0], sizes = [1, 256], strides = [1, 1]} : vector<9x256xf32> to vector<1x256xf32>
    %120 = vector.broadcast %119 : vector<1x256xf32> to vector<32x256xf32>
    %121 = arith.mulf %118, %120 : vector<32x256xf32>
    %122 = arith.addf %117, %121 : vector<32x256xf32>
    %123 = vector.extract_strided_slice %88 {offsets = [7, 0], sizes = [1, 256], strides = [1, 1]} : vector<9x256xf32> to vector<1x256xf32>
    %124 = vector.broadcast %123 : vector<1x256xf32> to vector<32x256xf32>
    %125 = arith.mulf %90, %124 : vector<32x256xf32>
    %126 = arith.addf %122, %125 : vector<32x256xf32>
    %c240_i32_37 = arith.constant 240 : i32
    %127 = tpu.dynamic_rotate %90 by %c240_i32_37 dim 1 : vector<32x256xf32>, i32 -> vector<32x256xf32>
    %128 = vector.extract_strided_slice %88 {offsets = [8, 0], sizes = [1, 256], strides = [1, 1]} : vector<9x256xf32> to vector<1x256xf32>
    %129 = vector.broadcast %128 : vector<1x256xf32> to vector<32x256xf32>
    %130 = arith.mulf %127, %129 : vector<32x256xf32>
    %131 = arith.addf %126, %130 : vector<32x256xf32>
    %c0_38 = arith.constant 0 : index
    %c0_39 = arith.constant 0 : index
    %132 = vector.load %arg7[%c0_38, %c0_39] : memref<256x256xf32, #tpu.memory_space<vmem>>, vector<256x256xf32>
    %cst_40 = arith.constant dense<0.000000e+00> : vector<32x256xf32>
    %133 = tpu.matmul %131, %132, %cst_40 {dimension_numbers = #tpu.dot_dimension_numbers<[1], [0], [0], [1], [0, 0, 1, 1], [], []>} : vector<32x256xf32>, vector<256x256xf32>, vector<32x256xf32> -> vector<32x256xf32>
    %cst_41 = arith.constant dense<0.000000e+00> : vector<256xf32>
    %134 = vector.multi_reduction <add>, %133, %cst_41 [0] : vector<32x256xf32> to vector<256xf32>
    %135 = vector.shape_cast %134 : vector<256xf32> to vector<1x256xf32>
    %c16_i32_42 = arith.constant 16 : i32
    %136 = tpu.dynamic_rotate %135 by %c16_i32_42 dim 1 : vector<1x256xf32>, i32 -> vector<1x256xf32>
    %137 = arith.addf %135, %136 : vector<1x256xf32>
    %c32_i32_43 = arith.constant 32 : i32
    %138 = tpu.dynamic_rotate %137 by %c32_i32_43 dim 1 : vector<1x256xf32>, i32 -> vector<1x256xf32>
    %139 = arith.addf %137, %138 : vector<1x256xf32>
    %c64_i32_44 = arith.constant 64 : i32
    %140 = tpu.dynamic_rotate %139 by %c64_i32_44 dim 1 : vector<1x256xf32>, i32 -> vector<1x256xf32>
    %141 = arith.addf %139, %140 : vector<1x256xf32>
    %c128_i32_45 = arith.constant 128 : i32
    %142 = tpu.dynamic_rotate %141 by %c128_i32_45 dim 1 : vector<1x256xf32>, i32 -> vector<1x256xf32>
    %143 = arith.addf %141, %142 : vector<1x256xf32>
    %144 = arith.mulf %133, %133 : vector<32x256xf32>
    %cst_46 = arith.constant dense<0.000000e+00> : vector<256xf32>
    %145 = vector.multi_reduction <add>, %144, %cst_46 [0] : vector<32x256xf32> to vector<256xf32>
    %146 = vector.shape_cast %145 : vector<256xf32> to vector<1x256xf32>
    %c16_i32_47 = arith.constant 16 : i32
    %147 = tpu.dynamic_rotate %146 by %c16_i32_47 dim 1 : vector<1x256xf32>, i32 -> vector<1x256xf32>
    %148 = arith.addf %146, %147 : vector<1x256xf32>
    %c32_i32_48 = arith.constant 32 : i32
    %149 = tpu.dynamic_rotate %148 by %c32_i32_48 dim 1 : vector<1x256xf32>, i32 -> vector<1x256xf32>
    %150 = arith.addf %148, %149 : vector<1x256xf32>
    %c64_i32_49 = arith.constant 64 : i32
    %151 = tpu.dynamic_rotate %150 by %c64_i32_49 dim 1 : vector<1x256xf32>, i32 -> vector<1x256xf32>
    %152 = arith.addf %150, %151 : vector<1x256xf32>
    %c128_i32_50 = arith.constant 128 : i32
    %153 = tpu.dynamic_rotate %152 by %c128_i32_50 dim 1 : vector<1x256xf32>, i32 -> vector<1x256xf32>
    %154 = arith.addf %152, %153 : vector<1x256xf32>
    %cst_51 = arith.constant 0.001953125 : f32
    %155 = vector.broadcast %cst_51 : f32 to vector<1x256xf32>
    %156 = arith.mulf %143, %155 : vector<1x256xf32>
    %cst_52 = arith.constant 0.001953125 : f32
    %157 = vector.broadcast %cst_52 : f32 to vector<1x256xf32>
    %158 = arith.mulf %154, %157 : vector<1x256xf32>
    %159 = arith.mulf %156, %156 : vector<1x256xf32>
    %160 = arith.subf %158, %159 : vector<1x256xf32>
    %cst_53 = arith.constant 9.99999974E-6 : f32
    %161 = vector.broadcast %cst_53 : f32 to vector<1x256xf32>
    %162 = arith.addf %160, %161 : vector<1x256xf32>
    %163 = math.rsqrt %162 : vector<1x256xf32>
    %164 = vector.broadcast %0 : f32 to vector<1x256xf32>
    %165 = arith.mulf %164, %163 : vector<1x256xf32>
    %166 = vector.broadcast %156 : vector<1x256xf32> to vector<32x256xf32>
    %167 = arith.subf %133, %166 : vector<32x256xf32>
    %168 = vector.broadcast %165 : vector<1x256xf32> to vector<32x256xf32>
    %169 = arith.mulf %167, %168 : vector<32x256xf32>
    %c0_54 = arith.constant 0 : index
    %c0_55 = arith.constant 0 : index
    %170 = vector.load %arg8[%c0_54, %c0_55] : memref<32x256xf32, #tpu.memory_space<vmem>>, vector<32x256xf32>
    tpu.vector_store %arg8[%c0_54, %c0_55], %169 {strides = array<i32>} : memref<32x256xf32, #tpu.memory_space<vmem>>, vector<32x256xf32>,
    return
  }
}

</mosaic_0001>

<bundles_post_ra>
// kernel: tpu_custom_call.1
= control target key start
LH: loop header
LB: loop body
LE: loop exit
PB: predicated region body
PF: predicated region fallthrough
CT: control target
= control target key end

     0   :  { %14 = vsyncpa [#allocation4], 0  ;;  %s3412_s0 = inlined_call_operand.<no memory space> [shape: f32[1], index: 0, kind: input, shape index: {}]   ;;  %s3413_s1 = inlined_call_operand.hbm [shape: f32[32,256], index: 1, kind: input, shape index: {}]   ;;  %s3414_s2 = inlined_call_operand.hbm [shape: f32[32,32], index: 2, kind: input, shape index: {}]   ;;  %s3415_s3 = inlined_call_operand.hbm [shape: f32[32,32], index: 3, kind: input, shape index: {}]   ;;  %s3416_s4 = inlined_call_operand.hbm [shape: f32[9,256], index: 4, kind: input, shape index: {}]   ;;  %s3417_s5 = inlined_call_operand.hbm [shape: f32[256,256], index: 5, kind: input, shape index: {}]   ;;  %s3418_s6 = inlined_call_operand.hbm [shape: f32[9,256], index: 6, kind: input, shape index: {}]   ;;  %s3419_s7 = inlined_call_operand.hbm [shape: f32[256,256], index: 7, kind: input, shape index: {}]   ;;  %s3420_s8 = inlined_call_operand.hbm [shape: f32[32,256], index: 8, kind: output, shape index: {}]  }
   0x1   :  { %15 = vsyncpa [#allocation7], 0 }
   0x2   :  { %16 = vsyncpa [#allocation10], 0 }
   0x3   :  { %17 = vsyncpa [#allocation13], 0 }
   0x4   :  { %18 = vsyncpa [#allocation5], 0  ;;  %s2060_s27 = smov [#allocation6]  }
   0x5   :  { %s38_s28 = sshll.u32 %s2060_s27, 4  ;;  %s39_s28 = int_to_ptr.vmem [resolvable:$true] %s38_s28 }
   0x6   :  { %s1898_s29 = scalar_lea.vmem %s39_s28, 512  ;;  %p1903_p1 = scmp.lt.s32.totalorder %s39_s28, %s39_s28 }
   0x7   :  { %p1899_p0 = scmp.ne.s32.totalorder %s39_s28, %s1898_s29  ;;  %p1904_p2 = scmp.lt.s32.totalorder %s1898_s29, %s1898_s29 }
   0x9   :  { %p1905_p3 = por %p1904_p2, %p1903_p1 }
   0xb   :  { %p1906_p4 = pnand %p1905_p3, %p1899_p0 }
   0xd   :  { %1909 = shalt.err (!%p1906_p4)
}
   0xe   :  { %s2061_s30 = smov 128   ;;  %s2062_s9 = smov 8  }
   0xf   :  { %44 = dma.hbm_to_vmem [thread:$0]  %s3414_s2, 512, %s39_s28, [#allocation7], %s2061_s30, %s2061_s30, %s2062_s9  }
  0x10   :  { %s2063_s12 = smov [#allocation9]   ;;  %s2064_s14 = smov [#allocation12]  }
  0x11   :  { %s62_s13 = sshll.u32 %s2063_s12, 4  ;;  %s86_s15 = sshll.u32 %s2064_s14, 4  ;;  %s63_s13 = int_to_ptr.vmem [resolvable:$true] %s62_s13  ;;  %s87_s15 = int_to_ptr.vmem [resolvable:$true] %s86_s15 }
  0x12   :  { %s1918_s16 = scalar_lea.vmem %s63_s13, 512  ;;  %p1923_p6 = scmp.lt.s32.totalorder %s63_s13, %s63_s13 }
  0x13   :  { %p1919_p5 = scmp.ne.s32.totalorder %s63_s13, %s1918_s16  ;;  %p1924_p7 = scmp.lt.s32.totalorder %s1918_s16, %s1918_s16 }
  0x15   :  { %p1925_p8 = por %p1924_p7, %p1923_p6 }
  0x17   :  { %p1926_p9 = pnand %p1925_p8, %p1919_p5 }
  0x19   :  { %1929 = shalt.err (!%p1926_p9)
}
  0x1a   :  { %s2065_s17 = smov 256   ;;  %s2066_s18 = smov 16  }
  0x1b   :  { %68 = dma.hbm_to_vmem [thread:$0]  %s3416_s4, 512, %s63_s13, [#allocation10], %s2065_s17, %s2065_s17, %s2066_s18  }
  0x1c   :  { %s1938_s2 = scalar_lea.vmem %s87_s15, 512  ;;  %p1943_p11 = scmp.lt.s32.totalorder %s87_s15, %s87_s15 }
  0x1d   :  { %p1939_p10 = scmp.ne.s32.totalorder %s87_s15, %s1938_s2  ;;  %p1944_p12 = scmp.lt.s32.totalorder %s1938_s2, %s1938_s2 }
  0x1f   :  { %p1945_p13 = por %p1944_p12, %p1943_p11 }
  0x21   :  { %p1946_p0 = pnand %p1945_p13, %p1939_p10 }
  0x23   :  { %1949 = shalt.err (!%p1946_p0)
}
  0x24   :  { %92 = dma.hbm_to_vmem [thread:$0]  %s3418_s6, 512, %s87_s15, [#allocation13], %s2065_s17, %s2065_s17, %s2066_s18  }
  0x25   :  { %s2067_s23 = smov [#allocation3]   ;;  %s2068_s25 = smov [#allocation8]  }
  0x26   :  { %s26_s24 = sshll.u32 %s2067_s23, 4  ;;  %s50_s4 = sshll.u32 %s2068_s25, 4  ;;  %s27_s24 = int_to_ptr.vmem [resolvable:$true] %s26_s24  ;;  %s51_s4 = int_to_ptr.vmem [resolvable:$true] %s50_s4 }
  0x27   :  { %s1958_s26 = scalar_lea.vmem %s27_s24, 1024  ;;  %p1963_p2 = scmp.lt.s32.totalorder %s27_s24, %s27_s24 }
  0x28   :  { %p1959_p1 = scmp.ne.s32.totalorder %s27_s24, %s1958_s26  ;;  %p1964_p3 = scmp.lt.s32.totalorder %s1958_s26, %s1958_s26 }
  0x2a   :  { %p1965_p4 = por %p1964_p3, %p1963_p2 }
  0x2c   :  { %p1966_p5 = pnand %p1965_p4, %p1959_p1 }
  0x2e   :  { %1969 = shalt.err (!%p1966_p5)
}
  0x2f   :  { %32 = dma.hbm_to_vmem [thread:$0]  %s3413_s1, 1024, %s27_s24, [#allocation4], %s2065_s17, %s2065_s17, %s2066_s18  }
  0x30   :  { %s1978_s6 = scalar_lea.vmem %s51_s4, 512  ;;  %p1983_p7 = scmp.lt.s32.totalorder %s51_s4, %s51_s4 }
  0x31   :  { %p1979_p6 = scmp.ne.s32.totalorder %s51_s4, %s1978_s6  ;;  %p1984_p8 = scmp.lt.s32.totalorder %s1978_s6, %s1978_s6 }
  0x33   :  { %p1985_p9 = por %p1984_p8, %p1983_p7 }
  0x35   :  { %p1986_p10 = pnand %p1985_p9, %p1979_p6 }
  0x37   :  { %1989 = shalt.err (!%p1986_p10)
}
  0x38   :  { %56 = dma.hbm_to_vmem [thread:$0]  %s3415_s3, 512, %s51_s4, [#allocation7], %s2061_s30, %s2061_s30, %s2062_s9  }
  0x39   :  { %s2069_s11 = smov [#allocation11]   ;;  %s2070_s13 = smov [#allocation14]  }
  0x3a   :  { %s74_s12 = sshll.u32 %s2069_s11, 4  ;;  %s98_s1 = sshll.u32 %s2070_s13, 4  ;;  %s75_s12 = int_to_ptr.vmem [resolvable:$true] %s74_s12  ;;  %s99_s1 = int_to_ptr.vmem [resolvable:$true] %s98_s1 }
  0x3b   :  { %s1998_s14 = scalar_lea.vmem %s75_s12, 8192  ;;  %p2003_p12 = scmp.lt.s32.totalorder %s75_s12, %s75_s12 }
  0x3c   :  { %p1999_p11 = scmp.ne.s32.totalorder %s75_s12, %s1998_s14  ;;  %p2004_p13 = scmp.lt.s32.totalorder %s1998_s14, %s1998_s14 }
  0x3e   :  { %p2005_p0 = por %p2004_p13, %p2003_p12 }
  0x40   :  { %p2006_p1 = pnand %p2005_p0, %p1999_p11 }
  0x42   :  { %2009 = shalt.err (!%p2006_p1)
}
  0x43   :  { %80 = dma.hbm_to_vmem [thread:$0]  %s3417_s5, 8192, %s75_s12, [#allocation10], %s2065_s17, %s2065_s17, %s2066_s18  }
  0x44   :  { %s2018_s3 = scalar_lea.vmem %s99_s1, 8192  ;;  %p2023_p3 = scmp.lt.s32.totalorder %s99_s1, %s99_s1 }
  0x45   :  { %p2019_p2 = scmp.ne.s32.totalorder %s99_s1, %s2018_s3  ;;  %p2024_p4 = scmp.lt.s32.totalorder %s2018_s3, %s2018_s3 }
  0x47   :  { %p2025_p5 = por %p2024_p4, %p2023_p3 }
  0x49   :  { %p2026_p6 = pnand %p2025_p5, %p2019_p2 }
  0x4b   :  { %2029 = shalt.err (!%p2026_p6)
}
  0x4c   :  { %104 = dma.hbm_to_vmem [thread:$0]  %s3419_s7, 8192, %s99_s1, [#allocation13], %s2065_s17, %s2065_s17, %s2066_s18  }
  0x4d   :  { %2050 = dma.done.wait [#allocation4], 1024  }
  0x4e   :  { %2051 = vsyncadd [#allocation4], 4294966272 }
  0x4f   :  { %2052 = dma.done.wait [#allocation7], 1024  }
  0x50   :  { %2053 = vsyncadd [#allocation7], 4294966272 }
  0x51   :  { %2054 = dma.done.wait [#allocation10], 8704  }
  0x52   :  { %2055 = vsyncadd [#allocation10], 4294958592 }
  0x53   :  { %2056 = dma.done.wait [#allocation13], 8704  }
  0x54   :  { %2057 = vsyncadd [#allocation13], 4294958592  ;;  %v3421_v0 = vmov 0.0   ;;  %v142_v1 = vld [vmem:[#allocation3 + $0x38] sm:$0xff]  ;;  %v141_v2 = vld [vmem:[#allocation3 + $0x30] sm:$0xff]  ;;  %vm155_vm0 = vcmask 261120  }
  0x55   :  { %232 = vmatprep.mubr.f32.mxu0 %v3421_v0  ;;  %1069 = vmatprep.mubr.f32.mxu1 %v3421_v0  ;;  %v140_v3 = vld [vmem:[#allocation3 + $0x28] sm:$0xff]  ;;  %v2165_v4 = vmax.f32 %v142_v1, 0.0  ;;  %v2167_v5 = vmax.f32 %v141_v2, 0.0  ;;  %v139_v7 = vld [vmem:[#allocation3 + $0x20] sm:$0xff]  ;;  %v138_v8 = vld [vmem:[#allocation3 + $0x18] sm:$0xff]  ;;  %s2072_s5 = smov 112  }
  0x56   :  { %v2169_v6 = vmax.f32 %v140_v3, 0.0  ;;  %v137_v9 = vld [vmem:[#allocation3 + $0x10] sm:$0xff]  ;;  %v2171_v10 = vmax.f32 %v139_v7, 0.0  ;;  %v136_v11 = vld [vmem:[#allocation3 + $0x8] sm:$0xff]  ;;  %v135_v12 = vld [vmem:[#allocation3] sm:$0xff]  ;;  %v2174_v13 = vmax.f32 %v138_v8, 0.0 }
  0x57   :  { %3458 = vst [vmem:[#allocation21_spill] sm:$0xff] %v2165_v4  ;;  %3459 = vst [vmem:[#allocation22_spill] sm:$0xff] %v2167_v5  ;;  %192 = vmatprep.subr.mxu0 %v2165_v4  ;;  %v2176_v14 = vmax.f32 %v136_v11, 0.0  ;;  %v2179_v15 = vmax.f32 %v137_v9, 0.0  ;;  %v2181_v16 = vmax.f32 %v135_v12, 0.0  ;;  %v127_v17 = vld [vmem:[#allocation6] sm:$0xff] }
  0x58   :  { %3460 = vst [vmem:[#allocation23_spill] sm:$0xff] %v2169_v6  ;;  %193 = vmatpush1.msra.mxu0 %v2167_v5  ;;  %v128_v18 = vld [vmem:[#allocation6 + $0x8] sm:$0xff]  ;;  %v129_v19 = vld [vmem:[#allocation6 + $0x10] sm:$0xff]  ;;  %v130_v20 = vld [vmem:[#allocation6 + $0x18] sm:$0xff]  ;;  %s2073_s7 = smov 32   ;;  %s2074_s19 = smov 64  }
  0x59   :  { %194 = vmatprep.subr.mxu0 %v2169_v6  ;;  %482 = vrot.lane.b32.xlu1 %v2176_v14, %s2066_s18  ;;  %v131_v21 = vld [vmem:[#allocation8] sm:$0xff]  ;;  %v132_v22 = vld [vmem:[#allocation8 + $0x8] sm:$0xff]  ;;  %v133_v23 = vld [vmem:[#allocation8 + $0x10] sm:$0xff]  ;;  %s2075_s21 = smov [#allocation15]  }
  0x5a   :  { %195 = vmatpush1.msra.mxu0 %v2171_v10  ;;  %474 = vrot.lane.b32.xlu0 %v2181_v16, %s2066_s18  ;;  %v134_v24 = vld [vmem:[#allocation8 + $0x18] sm:$0xff]  ;;  %v744_v26 = vld [vmem:[#allocation11 + $0xf0] sm:$0xff]  ;;  %v743_v27 = vld [vmem:[#allocation11 + $0xe8] sm:$0xff]  ;;  %s1827_s22 = sshll.u32 %s2075_s21, 4  ;;  %s1828_s22 = int_to_ptr.vmem [resolvable:$true] %s1827_s22 }
  0x5b   :  { %196 = vmatprep.subr.mxu0 %v2174_v13  ;;  %v745_v25 = vld [vmem:[#allocation11 + $0xf8] sm:$0xff]  ;;  %v742_v28 = vld [vmem:[#allocation11 + $0xe0] sm:$0xff]  ;;  %v740_v30 = vld [vmem:[#allocation11 + $0xd0] sm:$0xff]  ;;  %p2035_p8 = scmp.lt.s32.totalorder %s1828_s22, %s1828_s22 }
  0x5c   :  { %197 = vmatpush1.msra.mxu0 %v2179_v15  ;;  %v741_v29 = vld [vmem:[#allocation11 + $0xd8] sm:$0xff]  ;;  %v739_v31 = vld [vmem:[#allocation11 + $0xc8] sm:$0xff]  ;;  %v738_v32 = vld [vmem:[#allocation11 + $0xc0] sm:$0xff] }
  0x5d   :  { %198 = vmatprep.subr.mxu0 %v2176_v14  ;;  %484 = vrot.lane.b32.xlu1 %v2174_v13, %s2066_s18  ;;  %v737_v33 = vld [vmem:[#allocation11 + $0xb8] sm:$0xff]  ;;  %v736_v34 = vld [vmem:[#allocation11 + $0xb0] sm:$0xff]  ;;  %v735_v35 = vld [vmem:[#allocation11 + $0xa8] sm:$0xff] }
  0x5e   :  { %199 = vmatpush1.msra.mxu0 %v2181_v16  ;;  %476 = vrot.lane.b32.xlu0 %v2179_v15, %s2066_s18  ;;  %v734_v36 = vld [vmem:[#allocation11 + $0xa0] sm:$0xff]  ;;  %v733_v37 = vld [vmem:[#allocation11 + $0x98] sm:$0xff]  ;;  %v732_v38 = vld [vmem:[#allocation11 + $0x90] sm:$0xff] }
  0x5f   :  { %1842 = vmatmul.mubr.msk.f32.vlgmr.msra.gmra.mxu0 %vm155_vm0, %v127_v17  ;;  %293 = vmatprep.subr.mxu0 %v2165_v4  ;;  %v731_v39 = vld [vmem:[#allocation11 + $0x88] sm:$0xff]  ;;  %v730_v40 = vld [vmem:[#allocation11 + $0x80] sm:$0xff]  ;;  %v729_v41 = vld [vmem:[#allocation11 + $0x78] sm:$0xff] }
  0x60   :  { %238 = vmatprep.mubr.f32.mxu0 %v3421_v0  ;;  %294 = vmatpush1.msra.mxu0 %v2167_v5  ;;  %v728_v42 = vld [vmem:[#allocation11 + $0x70] sm:$0xff]  ;;  %v727_v43 = vld [vmem:[#allocation11 + $0x68] sm:$0xff]  ;;  %v726_v44 = vld [vmem:[#allocation11 + $0x60] sm:$0xff] }
  0x61   :  { %295 = vmatprep.subr.mxu0 %v2169_v6  ;;  %554 = vrot.lane.b32.xlu1 %v2176_v14, %s2072_s5  ;;  %v725_v45 = vld [vmem:[#allocation11 + $0x58] sm:$0xff]  ;;  %v724_v46 = vld [vmem:[#allocation11 + $0x50] sm:$0xff]  ;;  %v723_v47 = vld [vmem:[#allocation11 + $0x48] sm:$0xff] }
  0x62   :  { %296 = vmatpush1.msra.mxu0 %v2171_v10  ;;  %546 = vrot.lane.b32.xlu0 %v2181_v16, %s2072_s5  ;;  %v722_v48 = vld [vmem:[#allocation11 + $0x40] sm:$0xff]  ;;  %v721_v49 = vld [vmem:[#allocation11 + $0x38] sm:$0xff]  ;;  %v720_v50 = vld [vmem:[#allocation11 + $0x30] sm:$0xff] }
  0x63   :  { %1843 = vmatmul.mubr.msk.f32.gmra.mxu0 %vm155_vm0, %v128_v18  ;;  %297 = vmatprep.subr.mxu0 %v2174_v13  ;;  %v719_v51 = vld [vmem:[#allocation11 + $0x28] sm:$0xff]  ;;  %v718_v52 = vld [vmem:[#allocation11 + $0x20] sm:$0xff]  ;;  %v717_v53 = vld [vmem:[#allocation11 + $0x18] sm:$0xff] }
  0x64   :  { %244 = vmatprep.mubr.f32.mxu0 %v3421_v0  ;;  %298 = vmatpush1.msra.mxu0 %v2179_v15  ;;  %v716_v54 = vld [vmem:[#allocation11 + $0x10] sm:$0xff]  ;;  %v715_v55 = vld [vmem:[#allocation11 + $0x8] sm:$0xff]  ;;  %v714_v56 = vld [vmem:[#allocation11] sm:$0xff] }
  0x65   :  { %299 = vmatprep.subr.mxu0 %v2176_v14  ;;  %486 = vrot.lane.b32.xlu1 %v2169_v6, %s2066_s18  ;;  %v777_v57 = vld [vmem:[#allocation11 + $0x1f8] sm:$0xff]  ;;  %v776_v58 = vld [vmem:[#allocation11 + $0x1f0] sm:$0xff]  ;;  %v775_v59 = vld [vmem:[#allocation11 + $0x1e8] sm:$0xff] }
  0x66   :  { %300 = vmatpush1.msra.mxu0 %v2181_v16  ;;  %478 = vrot.lane.b32.xlu0 %v2171_v10, %s2066_s18  ;;  %v774_v61 = vld [vmem:[#allocation11 + $0x1e0] sm:$0xff]  ;;  %v773_v62 = vld [vmem:[#allocation11 + $0x1d8] sm:$0xff]  ;;  %v772_v1 = vld [vmem:[#allocation11 + $0x1d0] sm:$0xff] }
  0x67   :  { %1844 = vmatmul.mubr.msk.f32.gmra.mxu0 %vm155_vm0, %v129_v19  ;;  %778 = vmatprep.subr.mxu0 %v745_v25  ;;  %v771_v2 = vld [vmem:[#allocation11 + $0x1c8] sm:$0xff]  ;;  %v770_v7 = vld [vmem:[#allocation11 + $0x1c0] sm:$0xff]  ;;  %v769_v8 = vld [vmem:[#allocation11 + $0x1b8] sm:$0xff] }
  0x68   :  { %250 = vmatprep.mubr.f32.mxu0 %v3421_v0  ;;  %v768_v9 = vld [vmem:[#allocation11 + $0x1b0] sm:$0xff]  ;;  %v767_v12 = vld [vmem:[#allocation11 + $0x1a8] sm:$0xff]  ;;  %v766_v17 = vld [vmem:[#allocation11 + $0x1a0] sm:$0xff] }
  0x69   :  { %556 = vrot.lane.b32.xlu1 %v2174_v13, %s2072_s5  ;;  %v765_v18 = vld [vmem:[#allocation11 + $0x198] sm:$0xff]  ;;  %v760_v25 = vld [vmem:[#allocation11 + $0x170] sm:$0xff] }
  0x6a   :  { %548 = vrot.lane.b32.xlu0 %v2179_v15, %s2072_s5 }
  0x6b   :  { %1845 = vmatmul.mubr.msk.f32.gmra.mxu0 %vm155_vm0, %v130_v20  ;;  %v764_v20 = vld [vmem:[#allocation11 + $0x190] sm:$0xff] }
  0x6c   :  { %333 = vmatprep.mubr.f32.mxu0 %v3421_v0 }
  0x6d   :  { %488 = vrot.lane.b32.xlu1 %v2165_v4, %s2066_s18 }
  0x6e   :  { %480 = vrot.lane.b32.xlu0 %v2167_v5, %s2066_s18 }
  0x6f   :  { %1846 = vmatmul.mubr.msk.f32.vlgmr.msra.gmra.mxu0 %vm155_vm0, %v131_v21  ;;  %v763_v21 = vld [vmem:[#allocation11 + $0x188] sm:$0xff] }
  0x70   :  { %339 = vmatprep.mubr.f32.mxu0 %v3421_v0  ;;  %779 = vmatpush1.msra.mxu0 %v744_v26  ;;  %v759_v26 = vld [vmem:[#allocation11 + $0x168] sm:$0xff] }
  0x71   :  { %558 = vrot.lane.b32.xlu1 %v2169_v6, %s2072_s5  ;;  %780 = vmatprep.subr.mxu0 %v743_v27 }
  0x72   :  { %550 = vrot.lane.b32.xlu0 %v2171_v10, %s2072_s5  ;;  %781 = vmatpush1.msra.mxu0 %v742_v28  ;;  %v758_v28 = vld [vmem:[#allocation11 + $0x160] sm:$0xff] }
  0x73   :  { %1847 = vmatmul.mubr.msk.f32.gmra.mxu0 %vm155_vm0, %v132_v22  ;;  %782 = vmatprep.subr.mxu0 %v741_v29  ;;  %v762_v22 = vld [vmem:[#allocation11 + $0x180] sm:$0xff]  ;;  %v757_v29 = vld [vmem:[#allocation11 + $0x158] sm:$0xff] }
  0x74   :  { %345 = vmatprep.mubr.f32.mxu0 %v3421_v0  ;;  %783 = vmatpush1.msra.mxu0 %v740_v30  ;;  %v756_v30 = vld [vmem:[#allocation11 + $0x150] sm:$0xff] }
  0x75   :  { %560 = vrot.lane.b32.xlu1 %v2165_v4, %s2072_s5  ;;  %784 = vmatprep.subr.mxu0 %v739_v31 }
  0x76   :  { %552 = vrot.lane.b32.xlu0 %v2167_v5, %s2072_s5  ;;  %785 = vmatpush1.msra.mxu0 %v738_v32  ;;  %v755_v32 = vld [vmem:[#allocation11 + $0x148] sm:$0xff] }
  0x77   :  { %1848 = vmatmul.mubr.msk.f32.gmra.mxu0 %vm155_vm0, %v133_v23  ;;  %786 = vmatprep.subr.mxu0 %v737_v33  ;;  %v754_v33 = vld [vmem:[#allocation11 + $0x140] sm:$0xff] }
  0x78   :  { %351 = vmatprep.mubr.f32.mxu0 %v3421_v0  ;;  %787 = vmatpush1.msra.mxu0 %v736_v34  ;;  %v753_v34 = vld [vmem:[#allocation11 + $0x138] sm:$0xff] }
  0x79   :  { %788 = vmatprep.subr.mxu0 %v735_v35 }
  0x7a   :  { %789 = vmatpush1.msra.mxu0 %v734_v36  ;;  %v752_v36 = vld [vmem:[#allocation11 + $0x130] sm:$0xff] }
  0x7b   :  { %1849 = vmatmul.mubr.msk.f32.gmra.mxu0 %vm155_vm0, %v134_v24  ;;  %790 = vmatprep.subr.mxu0 %v733_v37  ;;  %v761_v24 = vld [vmem:[#allocation11 + $0x178] sm:$0xff]  ;;  %v751_v37 = vld [vmem:[#allocation11 + $0x128] sm:$0xff] }
  0x7c   :  { %791 = vmatpush1.msra.mxu0 %v732_v38  ;;  %v750_v38 = vld [vmem:[#allocation11 + $0x120] sm:$0xff] }
  0x7d   :  { %792 = vmatprep.subr.mxu0 %v731_v39 }
  0x7e   :  { %793 = vmatpush1.msra.mxu0 %v730_v40  ;;  %v749_v40 = vld [vmem:[#allocation11 + $0x118] sm:$0xff] }
  0x7f   :  { %794 = vmatprep.subr.mxu0 %v729_v41  ;;  %v748_v41 = vld [vmem:[#allocation11 + $0x110] sm:$0xff] }
  0x80   :  { %795 = vmatpush1.msra.mxu0 %v728_v42  ;;  %v747_v42 = vld [vmem:[#allocation11 + $0x108] sm:$0xff] }
  0x81   :  { %796 = vmatprep.subr.mxu0 %v727_v43 }
  0x82   :  { %797 = vmatpush1.msra.mxu0 %v726_v44  ;;  %v746_v44 = vld [vmem:[#allocation11 + $0x100] sm:$0xff] }
  0x83   :  { %798 = vmatprep.subr.mxu0 %v725_v45 }
  0x84   :  { %799 = vmatpush1.msra.mxu0 %v724_v46 }
  0x85   :  { %800 = vmatprep.subr.mxu0 %v723_v47 }
  0x86   :  { %801 = vmatpush1.msra.mxu0 %v722_v48 }
  0x87   :  { %802 = vmatprep.subr.mxu0 %v721_v49 }
  0x88   :  { %803 = vmatpush1.msra.mxu0 %v720_v50 }
  0x89   :  { %804 = vmatprep.subr.mxu0 %v719_v51 }
  0x8a   :  { %805 = vmatpush1.msra.mxu0 %v718_v52 }
  0x8b   :  { %806 = vmatprep.subr.mxu0 %v717_v53 }
  0x8c   :  { %807 = vmatpush1.msra.mxu0 %v716_v54 }
  0x8d   :  { %808 = vmatprep.subr.mxu0 %v715_v55 }
  0x8e   :  { %809 = vmatpush1.msra.mxu0 %v714_v56 }
  0x8f   :  { %810 = vmatprep.subr.mxu0 %v777_v57 }
  0x90   :  { %811 = vmatpush2.msra.mxu0 %v776_v58 }
  0x91   :  { %812 = vmatprep.subr.mxu0 %v775_v59 }
  0x92   :  { %813 = vmatpush2.msra.mxu0 %v774_v61 }
  0x93   :  { %814 = vmatprep.subr.mxu0 %v773_v62 }
  0x94   :  { %815 = vmatpush2.msra.mxu0 %v772_v1 }
  0x95   :  { %816 = vmatprep.subr.mxu0 %v771_v2 }
  0x96   :  { %817 = vmatpush2.msra.mxu0 %v770_v7 }
  0x97   :  { %818 = vmatprep.subr.mxu0 %v769_v8 }
  0x98   :  { %819 = vmatpush2.msra.mxu0 %v768_v9  ;;  %v374_v9 = vlaneseq }
  0x99   :  { %820 = vmatprep.subr.mxu0 %v767_v12 }
  0x9a   :  { %821 = vmatpush2.msra.mxu0 %v766_v17  ;;  %v2360_v12 = vshrl.u32 %v374_v9, 7 }
  0x9b   :  { %822 = vmatprep.subr.mxu0 %v765_v18 }
  0x9c   :  { %823 = vmatpush2.msra.mxu0 %v764_v20  ;;  %v2362_v20 = vand.u32 127, %v374_v9  ;;  %v2459_v4 = vsub.s32 4, %v2360_v12 }
  0x9d   :  { %824 = vmatprep.subr.mxu0 %v763_v21  ;;  %v2365_v21 = vsub.s32 1, %v2360_v12 }
  0x9e   :  { %825 = vmatpush2.msra.mxu0 %v762_v22  ;;  %vm376_vm1 = vcmp.lt.s32.totalorder %v2362_v20, 16  ;;  %vm441_vm2 = vcmp.lt.s32.totalorder %v2362_v20, 112  ;;  %3477 = vst [vmem:[#allocation40_spill] sm:$0xff] %v2459_v4  ;;  %vm897_vm3 = vcmp.lt.s32.totalorder %v2362_v20, 32  ;;  %vm906_vm4 = vcmp.lt.s32.totalorder %v2362_v20, 64 }
  0x9f   :  { %826 = vmatprep.subr.mxu0 %v761_v24  ;;  %3470 = vst [vmem:[#allocation33_spill] sm:$0xff] %v2365_v21 }
  0xa0   :  { %827 = vmatpush2.msra.mxu0 %v760_v25  ;;  %v2367_v25 = vld [vmem:[#allocation9] sm:$0xff] }
  0xa1   :  { %828 = vmatprep.subr.mxu0 %v759_v26  ;;  %v2370_v26 = vsub.s32 3, %v2360_v12 }
  0xa2   :  { %829 = vmatpush2.msra.mxu0 %v758_v28  ;;  %v2372_v28 = vld [vmem:[#allocation9 + $0x8] sm:$0xff] }
  0xa3   :  { %830 = vmatprep.subr.mxu0 %v757_v29  ;;  %3471 = vst [vmem:[#allocation34_spill] sm:$0xff] %v2370_v26  ;;  %v2375_v29 = vsub.s32 0, %v2360_v12 }
  0xa4   :  { %831 = vmatpush2.msra.mxu0 %v756_v30  ;;  %v2379_v30 = vsub.s32 7, %v2360_v12 }
  0xa5   :  { %832 = vmatprep.subr.mxu0 %v755_v32  ;;  %3472 = vst [vmem:[#allocation35_spill] sm:$0xff] %v2375_v29  ;;  %v2383_v32 = vrot.slane %v2367_v25, %v2365_v21  ;;  %v2410_v9 = vrot.slane %v2372_v28, %v2375_v29 }
  0xa6   :  { %833 = vmatpush2.msra.mxu0 %v754_v33  ;;  %3473 = vst [vmem:[#allocation36_spill] sm:$0xff] %v2379_v30  ;;  %v2415_v0 = vrot.slane %v2367_v25, %v2379_v30 }
  0xa7   :  { %834 = vmatprep.subr.mxu0 %v753_v34 }
  0xa8   :  { %835 = vmatpush2.msra.mxu0 %v752_v36  ;;  %v2387_v36 = vrot.slane %v2372_v28, %v2365_v21 }
  0xa9   :  { %836 = vmatprep.subr.mxu0 %v751_v37  ;;  %v2391_v37 = vrot.slane %v2367_v25, %v2370_v26 }
  0xaa   :  { %837 = vmatpush2.msra.mxu0 %v750_v38  ;;  %v2395_v38 = vrot.slane %v2372_v28, %v2370_v26 }
  0xab   :  { %838 = vmatprep.subr.mxu0 %v749_v40  ;;  %3474 = vst [vmem:[#allocation37_spill] sm:$0xff] %v2391_v37  ;;  %v2398_v40 = vsub.s32 5, %v2360_v12 }
  0xac   :  { %839 = vmatpush2.msra.mxu0 %v748_v41 }
  0xad   :  { %840 = vmatprep.subr.mxu0 %v747_v42  ;;  %3475 = vst [vmem:[#allocation38_spill] sm:$0xff] %v2398_v40 }
  0xae   :  { %841 = vmatpush2.msra.mxu0 %v746_v44  ;;  %v2406_v44 = vrot.slane %v2367_v25, %v2375_v29 }
  0xcb   :  { %v483_v50 = vpop.permute.xlu1 %482 }
  0xcc   :  { %v475_v51 = vpop.permute.xlu0 %474 }
  0xcd   :  { %v490_v41 = vsel %vm376_vm1, %v475_v51, %v483_v50  ;;  %v494_v42 = vsel %vm376_vm1, %v483_v50, %v475_v51  ;;  %v2423_v51 = vrot.slane %v2372_v28, %v2379_v30 }
  0xcf   :  { %v485_v52 = vpop.permute.xlu1 %484 }
  0xd0   :  { %v477_v53 = vpop.permute.xlu0 %476 }
  0xd1   :  { %v491_v21 = vsel %vm376_vm1, %v477_v53, %v485_v52  ;;  %v495_v29 = vsel %vm376_vm1, %v485_v52, %v477_v53 }
  0xd3   :  { %v555_v54 = vpop.permute.xlu1 %554 }
  0xd4   :  { %v547_v55 = vpop.permute.xlu0 %546 }
  0xd5   :  { %v562_v52 = vsel %vm441_vm2, %v547_v55, %v555_v54  ;;  %v566_v53 = vsel %vm441_vm2, %v555_v54, %v547_v55 }
  0xd7   :  { %v2340_v56 = vpop.permute.xlu1 %486 }
  0xd8   :  { %v2342_v57 = vpop.permute.xlu0 %478 }
  0xdb   :  { %v2344_v58 = vpop.permute.xlu1 %556 }
  0xdc   :  { %v2346_v59 = vpop.permute.xlu0 %548 }
  0xdf   :  { %v2348_v61 = vpop.permute.xlu1 %488 }
  0xe0   :  { %v2350_v62 = vpop.permute.xlu0 %480 }
  0xe3   :  { %v2352_v1 = vpop.permute.xlu1 %558 }
  0xe4   :  { %v2354_v2 = vpop.permute.xlu0 %550 }
  0xe7   :  { %v2356_v7 = vpop.permute.xlu1 %560 }
  0xe8   :  { %3468 = vst [vmem:[#allocation31_spill] sm:$0xff] %v2356_v7  ;;  %v2358_v8 = vpop.permute.xlu0 %552  ;;  %v2452_v7 = vmul.f32 %v2395_v38, %v491_v21 }
  0xe9   :  { %3469 = vst [vmem:[#allocation32_spill] sm:$0xff] %v2358_v8  ;;  %v507_v8 = vmul.f32 %v2395_v38, %v490_v41  ;;  %v2449_v41 = vmul.f32 %v2391_v37, %v495_v29 }
 0x11f   :  { %v2244_v60 = vpop.f32.mrf.mxu0 }
 0x120   :  { %425 = vrot.lane.b32.xlu1 %v2244_v60, %s2072_s5  ;;  %358 = vrot.lane.b32.xlu0 %v2244_v60, %s2066_s18  ;;  %v409_v54 = vmul.f32 %v2383_v32, %v2244_v60 }
 0x121   :  { %v2250_v63 = vpop.f32.mrf.mxu0 }
 0x122   :  { %v410_v55 = vmul.f32 %v2387_v36, %v2250_v63 }
 0x123   :  { %v2252_v3 = vpop.f32.mrf.mxu0 }
 0x124   :  { %433 = vrot.lane.b32.xlu1 %v2250_v63, %s2072_s5  ;;  %366 = vrot.lane.b32.xlu0 %v2250_v63, %s2066_s18 }
 0x125   :  { %v2258_v11 = vpop.f32.mrf.mxu0 }
 0x127   :  { %v2264_v19 = vpop.f32.mrf.mxu0 }
 0x128   :  { %360 = vrot.lane.b32.xlu0 %v2252_v3, %s2066_s18  ;;  %368 = vrot.lane.b32.xlu1 %v2258_v11, %s2066_s18 }
 0x129   :  { %v2270_v23 = vpop.f32.mrf.mxu0 }
 0x12b   :  { %v2276_v27 = vpop.f32.mrf.mxu0 }
 0x12c   :  { %427 = vrot.lane.b32.xlu0 %v2252_v3, %s2072_s5  ;;  %435 = vrot.lane.b32.xlu1 %v2258_v11, %s2072_s5 }
 0x12d   :  { %v2282_v31 = vpop.f32.mrf.mxu0 }
 0x12e   :  { %3461 = vst [vmem:[#allocation24_spill] sm:$0xff] %v2282_v31 }
 0x12f   :  { %v2288_v35 = vpop.f32.mrf.mxu0 }
 0x130   :  { %362 = vrot.lane.b32.xlu0 %v2264_v19, %s2066_s18  ;;  %370 = vrot.lane.b32.xlu1 %v2270_v23, %s2066_s18 }
 0x131   :  { %v2294_v39 = vpop.f32.mrf.mxu0 }
 0x133   :  { %v2300_v43 = vpop.f32.mrf.mxu0 }
 0x134   :  { %429 = vrot.lane.b32.xlu0 %v2264_v19, %s2072_s5  ;;  %437 = vrot.lane.b32.xlu1 %v2270_v23, %s2072_s5  ;;  %3462 = vst [vmem:[#allocation25_spill] sm:$0xff] %v2300_v43 }
 0x135   :  { %v2306_v45 = vpop.f32.mrf.mxu0 }
 0x136   :  { %3463 = vst [vmem:[#allocation26_spill] sm:$0xff] %v2306_v45 }
 0x137   :  { %v2312_v46 = vpop.f32.mrf.mxu0 }
 0x138   :  { %364 = vrot.lane.b32.xlu0 %v2276_v27, %s2066_s18  ;;  %372 = vrot.lane.b32.xlu1 %v2282_v31, %s2066_s18  ;;  %3464 = vst [vmem:[#allocation27_spill] sm:$0xff] %v2312_v46 }
 0x139   :  { %v2318_v47 = vpop.f32.mrf.mxu0 }
 0x13a   :  { %3465 = vst [vmem:[#allocation28_spill] sm:$0xff] %v2318_v47 }
 0x13b   :  { %v2324_v48 = vpop.f32.mrf.mxu0 }
 0x13c   :  { %431 = vrot.lane.b32.xlu0 %v2276_v27, %s2072_s5  ;;  %439 = vrot.lane.b32.xlu1 %v2282_v31, %s2072_s5  ;;  %3466 = vst [vmem:[#allocation29_spill] sm:$0xff] %v2324_v48 }
 0x13d   :  { %v2330_v49 = vpop.f32.mrf.mxu0 }
 0x13e   :  { %3467 = vst [vmem:[#allocation30_spill] sm:$0xff] %v2330_v49 }
 0x140   :  { %594 = vrot.lane.b32.xlu0 %v2288_v35, %s2066_s18  ;;  %602 = vrot.lane.b32.xlu1 %v2294_v39, %s2066_s18 }
 0x144   :  { %666 = vrot.lane.b32.xlu0 %v2288_v35, %s2072_s5  ;;  %674 = vrot.lane.b32.xlu1 %v2294_v39, %s2072_s5 }
 0x148   :  { %596 = vrot.lane.b32.xlu0 %v2300_v43, %s2066_s18  ;;  %604 = vrot.lane.b32.xlu1 %v2306_v45, %s2066_s18 }
 0x14c   :  { %668 = vrot.lane.b32.xlu0 %v2300_v43, %s2072_s5  ;;  %676 = vrot.lane.b32.xlu1 %v2306_v45, %s2072_s5 }
 0x150   :  { %598 = vrot.lane.b32.xlu0 %v2312_v46, %s2066_s18  ;;  %606 = vrot.lane.b32.xlu1 %v2318_v47, %s2066_s18 }
 0x154   :  { %670 = vrot.lane.b32.xlu0 %v2312_v46, %s2072_s5  ;;  %678 = vrot.lane.b32.xlu1 %v2318_v47, %s2072_s5  ;;  %v506_v46 = vmul.f32 %v2391_v37, %v494_v42 }
 0x158   :  { %600 = vrot.lane.b32.xlu0 %v2324_v48, %s2066_s18  ;;  %608 = vrot.lane.b32.xlu1 %v2330_v49, %s2066_s18 }
 0x15c   :  { %672 = vrot.lane.b32.xlu0 %v2324_v48, %s2072_s5  ;;  %680 = vrot.lane.b32.xlu1 %v2330_v49, %s2072_s5  ;;  %v2430_v49 = vsub.s32 2, %v2360_v12 }
 0x15e   :  { %3476 = vst [vmem:[#allocation39_spill] sm:$0xff] %v2430_v49  ;;  %v2471_v21 = vrot.slane %v2372_v28, %v2430_v49 }
 0x192   :  { %v426_v17 = vpop.permute.xlu1 %425  ;;  %v359_v18 = vpop.permute.xlu0 %358 }
 0x196   :  { %v434_v22 = vpop.permute.xlu1 %433  ;;  %v367_v24 = vpop.permute.xlu0 %366 }
 0x197   :  { %v377_v26 = vsel %vm376_vm1, %v359_v18, %v367_v24  ;;  %v381_v50 = vsel %vm376_vm1, %v367_v24, %v359_v18  ;;  %v2436_v18 = vrot.slane %v2367_v25, %v2398_v40  ;;  %v2440_v24 = vrot.slane %v2372_v28, %v2398_v40 }
 0x198   :  { %v393_v30 = vmul.f32 %v2406_v44, %v381_v50  ;;  %v394_v42 = vmul.f32 %v2410_v9, %v377_v26  ;;  %v496_v40 = vsel %vm376_vm1, %v2340_v56, %v2342_v57  ;;  %v2467_v26 = vrot.slane %v2367_v25, %v2430_v49 }
 0x199   :  { %v2474_v5 = vmul.f32 %v2436_v18, %v562_v52  ;;  %v2477_v45 = vmul.f32 %v2440_v24, %v566_v53  ;;  %v442_v60 = vsel %vm441_vm2, %v426_v17, %v434_v22  ;;  %v446_v63 = vsel %vm441_vm2, %v434_v22, %v426_v17 }
 0x19a   :  { %v361_v33 = vpop.permute.xlu0 %360  ;;  %v369_v34 = vpop.permute.xlu1 %368  ;;  %v417_v43 = vadd.f32 %v409_v54, %v393_v30  ;;  %v418_v6 = vadd.f32 %v410_v55, %v394_v42  ;;  %v492_v52 = vsel %vm376_vm1, %v2342_v57, %v2340_v56  ;;  %v2492_v53 = vmul.f32 %v2391_v37, %v496_v40 }
 0x19b   :  { %v378_v49 = vsel %vm376_vm1, %v361_v33, %v369_v34  ;;  %v382_v31 = vsel %vm376_vm1, %v369_v34, %v361_v33  ;;  %v563_v17 = vsel %vm441_vm2, %v2346_v59, %v2344_v58  ;;  %v2500_v22 = vrot.slane %v2367_v25, %v2459_v4 }
 0x19c   :  { %3478 = vst [vmem:[#allocation41_spill] sm:$0xff] %v2492_v53  ;;  %v458_v30 = vmul.f32 %v2467_v26, %v442_v60  ;;  %v459_v33 = vmul.f32 %v2471_v21, %v446_v63  ;;  %v567_v42 = vsel %vm441_vm2, %v2344_v58, %v2346_v59  ;;  %v395_v54 = vmul.f32 %v2406_v44, %v382_v31 }
 0x19d   :  { %v396_v55 = vmul.f32 %v2410_v9, %v378_v49  ;;  %v2516_v60 = vrot.slane %v2372_v28, %v2459_v4  ;;  %v2519_v63 = vmul.f32 %v2395_v38, %v492_v52  ;;  %v411_v53 = vmul.f32 %v2383_v32, %v2252_v3 }
 0x19e   :  { %v428_v48 = vpop.permute.xlu0 %427  ;;  %v436_v47 = vpop.permute.xlu1 %435  ;;  %v467_v37 = vadd.f32 %v459_v33, %v418_v6  ;;  %v412_v31 = vmul.f32 %v2387_v36, %v2258_v11  ;;  %v2531_v59 = vmul.f32 %v2440_v24, %v567_v42  ;;  %v2537_v52 = vsel %vm376_vm1, %v2350_v62, %v2348_v61 }
 0x19f   :  { %v443_v34 = vsel %vm441_vm2, %v428_v48, %v436_v47  ;;  %v447_v56 = vsel %vm441_vm2, %v436_v47, %v428_v48  ;;  %v2522_v47 = vmul.f32 %v2436_v18, %v563_v17  ;;  %v466_v48 = vadd.f32 %v458_v30, %v417_v43 }
 0x1a0   :  { %v460_v49 = vmul.f32 %v2467_v26, %v443_v34  ;;  %v461_v58 = vmul.f32 %v2471_v21, %v447_v56  ;;  %v2543_v6 = vsel %vm376_vm1, %v2348_v61, %v2350_v62  ;;  %v530_v43 = vmul.f32 %v2500_v22, %v2181_v16 }
 0x1a1   :  { %v419_v17 = vadd.f32 %v411_v53, %v395_v54  ;;  %v420_v30 = vadd.f32 %v412_v31, %v396_v55  ;;  %v531_v33 = vmul.f32 %v2516_v60, %v2176_v14  ;;  %v2550_v34 = vsub.s32 6, %v2360_v12 }
 0x1a2   :  { %v363_v29 = vpop.permute.xlu0 %362  ;;  %v371_v50 = vpop.permute.xlu1 %370  ;;  %v514_v56 = vadd.f32 %v506_v46, %v466_v48  ;;  %v515_v42 = vadd.f32 %v507_v8, %v467_v37  ;;  %v2560_v16 = vsel %vm441_vm2, %v2354_v2, %v2352_v1  ;;  %v2566_v14 = vsel %vm441_vm2, %v2352_v1, %v2354_v2 }
 0x1a3   :  { %v379_v4 = vsel %vm376_vm1, %v363_v29, %v371_v50  ;;  %v383_v61 = vsel %vm376_vm1, %v371_v50, %v363_v29  ;;  %v468_v46 = vadd.f32 %v460_v49, %v419_v17  ;;  %v469_v62 = vadd.f32 %v461_v58, %v420_v30 }
 0x1a4   :  { %v532_v50 = vmul.f32 %v2500_v22, %v2179_v15  ;;  %v533_v53 = vmul.f32 %v2516_v60, %v2174_v13  ;;  %v413_v1 = vmul.f32 %v2383_v32, %v2264_v19  ;;  %v414_v2 = vmul.f32 %v2387_v36, %v2270_v23 }
 0x1a5   :  { %v397_v54 = vmul.f32 %v2406_v44, %v383_v61  ;;  %v398_v55 = vmul.f32 %v2410_v9, %v379_v4  ;;  %v538_v48 = vadd.f32 %v530_v43, %v514_v56  ;;  %v2588_v15 = vrot.slane %v2372_v28, %v2550_v34 }
 0x1a6   :  { %v430_v57 = vpop.permute.xlu0 %429  ;;  %v438_v40 = vpop.permute.xlu1 %437  ;;  %v516_v13 = vadd.f32 %v2449_v41, %v468_v46  ;;  %v517_v19 = vadd.f32 %v2452_v7, %v469_v62  ;;  %v415_v4 = vmul.f32 %v2383_v32, %v2276_v27  ;;  %v650_v49 = vmul.f32 %v2415_v0, %v2288_v35 }
 0x1a7   :  { %v444_v8 = vsel %vm441_vm2, %v430_v57, %v438_v40  ;;  %v448_v12 = vsel %vm441_vm2, %v438_v40, %v430_v57  ;;  %v539_v57 = vadd.f32 %v531_v33, %v515_v42  ;;  %v2584_v40 = vrot.slane %v2367_v25, %v2550_v34  ;;  %v2610_v42 = vld [vmem:[#allocation9 + $0x10] ss:$0 sm:$0xff] }
 0x1a8   :  { %v462_v23 = vmul.f32 %v2467_v26, %v444_v8  ;;  %v463_v31 = vmul.f32 %v2471_v21, %v448_v12  ;;  %v651_v25 = vmul.f32 %v2423_v51, %v2294_v39  ;;  %v534_v41 = vmul.f32 %v2500_v22, %v2171_v10  ;;  %v2612_v10 = vld [vmem:[#allocation9 + $0x18] ss:$0 sm:$0xff] }
 0x1a9   :  { %v421_v43 = vadd.f32 %v413_v1, %v397_v54  ;;  %v422_v7 = vadd.f32 %v414_v2, %v398_v55  ;;  %v586_v27 = vadd.f32 %v2474_v5, %v538_v48  ;;  %v587_v35 = vadd.f32 %v2477_v45, %v539_v57  ;;  %v3479_v57 = vld [vmem:[#allocation24_spill] sm:$0xff] }
 0x1aa   :  { %v365_v3 = vpop.permute.xlu0 %364  ;;  %v373_v11 = vpop.permute.xlu1 %372  ;;  %v540_v61 = vadd.f32 %v532_v50, %v516_v13  ;;  %v541_v46 = vadd.f32 %v533_v53, %v517_v19  ;;  %v416_v13 = vmul.f32 %v2387_v36, %v3479_v57 }
 0x1ab   :  { %v470_v33 = vadd.f32 %v462_v23, %v421_v43  ;;  %v471_v56 = vadd.f32 %v463_v31, %v422_v7  ;;  %v380_v62 = vsel %vm376_vm1, %v365_v3, %v373_v11  ;;  %v384_v5 = vsel %vm376_vm1, %v373_v11, %v365_v3  ;;  %v3481_v31 = vld [vmem:[#allocation41_spill] sm:$0xff] }
 0x1ac   :  { %v399_v19 = vmul.f32 %v2406_v44, %v384_v5  ;;  %v400_v23 = vmul.f32 %v2410_v9, %v380_v62  ;;  %v588_v9 = vadd.f32 %v2522_v47, %v540_v61 }
 0x1ae   :  { %v432_v37 = vpop.permute.xlu0 %431  ;;  %v440_v29 = vpop.permute.xlu1 %439 }
 0x1af   :  { %v445_v2 = vsel %vm441_vm2, %v432_v37, %v440_v29  ;;  %v449_v54 = vsel %vm441_vm2, %v440_v29, %v432_v37  ;;  %v3480_v37 = vld [vmem:[#allocation23_spill] sm:$0xff] }
 0x1b0   :  { %v535_v29 = vmul.f32 %v2516_v60, %v3480_v37 }
 0x1b2   :  { %v595_v58 = vpop.permute.xlu0 %594  ;;  %v603_v28 = vpop.permute.xlu1 %602 }
 0x1b3   :  { %v610_v17 = vsel %vm376_vm1, %v595_v58, %v603_v28  ;;  %v614_v30 = vsel %vm376_vm1, %v603_v28, %v595_v58  ;;  %v518_v58 = vadd.f32 %v3481_v31, %v470_v33  ;;  %v519_v28 = vadd.f32 %v2519_v63, %v471_v56 }
 0x1b4   :  { %v626_v32 = vmul.f32 %v2584_v40, %v614_v30  ;;  %v627_v39 = vmul.f32 %v2588_v15, %v610_v17  ;;  %v465_v30 = vmul.f32 %v2471_v21, %v449_v54  ;;  %v423_v33 = vadd.f32 %v415_v4, %v399_v19 }
 0x1b5   :  { %v424_v56 = vadd.f32 %v416_v13, %v400_v23  ;;  %v542_v61 = vadd.f32 %v534_v41, %v518_v58  ;;  %v513_v41 = vmul.f32 %v2395_v38, %v2537_v52  ;;  %v3485_v23 = vld [vmem:[#allocation22_spill] sm:$0xff] }
 0x1b6   :  { %v634_v8 = vadd.f32 %v626_v32, %v586_v27  ;;  %v635_v45 = vadd.f32 %v627_v39, %v587_v35  ;;  %v667_v12 = vpop.permute.xlu0 %666  ;;  %v675_v1 = vpop.permute.xlu1 %674  ;;  %v589_v27 = vadd.f32 %v2531_v59, %v541_v46  ;;  %v3482_v32 = vld [vmem:[#allocation25_spill] sm:$0xff]  ;;  %v3483_v39 = vld [vmem:[#allocation26_spill] sm:$0xff]  ;;  %v543_v59 = vadd.f32 %v535_v29, %v519_v28 }
 0x1b7   :  { %v682_v50 = vsel %vm441_vm2, %v667_v12, %v675_v1  ;;  %v686_v53 = vsel %vm441_vm2, %v675_v1, %v667_v12  ;;  %v653_v21 = vmul.f32 %v2423_v51, %v3483_v39  ;;  %v536_v37 = vmul.f32 %v2500_v22, %v3485_v23  ;;  %v3486_v29 = vld [vmem:[#allocation21_spill] sm:$0xff]  ;;  %v3488_v22 = vld [vmem:[#allocation32_spill] sm:$0xff] }
 0x1b8   :  { %v658_v55 = vadd.f32 %v650_v49, %v634_v8  ;;  %v698_v48 = vmul.f32 %v2610_v42, %v682_v50  ;;  %v699_v3 = vmul.f32 %v2612_v10, %v686_v53  ;;  %v659_v11 = vadd.f32 %v651_v25, %v635_v45  ;;  %v3484_v53 = vld [vmem:[#allocation37_spill] sm:$0xff] }
 0x1b9   :  { %v464_v25 = vmul.f32 %v2467_v26, %v445_v2  ;;  %v652_v26 = vmul.f32 %v2415_v0, %v3482_v32  ;;  %v473_v45 = vadd.f32 %v465_v30, %v424_v56  ;;  %v537_v31 = vmul.f32 %v2516_v60, %v3486_v29  ;;  %v3490_v30 = vld [vmem:[#allocation28_spill] sm:$0xff] }
 0x1ba   :  { %v706_v49 = vadd.f32 %v698_v48, %v658_v55  ;;  %v597_v43 = vpop.permute.xlu0 %596  ;;  %v605_v7 = vpop.permute.xlu1 %604  ;;  %v707_v17 = vadd.f32 %v699_v3, %v659_v11  ;;  %v512_v55 = vmul.f32 %v3484_v53, %v2543_v6  ;;  %v582_v48 = vmul.f32 %v2436_v18, %v2560_v16 }
 0x1bb   :  { %v611_v36 = vsel %vm376_vm1, %v597_v43, %v605_v7  ;;  %v615_v44 = vsel %vm376_vm1, %v605_v7, %v597_v43  ;;  %v472_v46 = vadd.f32 %v464_v25, %v423_v33  ;;  %v583_v3 = vmul.f32 %v2440_v24, %v2566_v14  ;;  %v3487_v43 = vld [vmem:[#allocation31_spill] sm:$0xff] }
 0x1bc   :  { %v628_v63 = vmul.f32 %v2584_v40, %v615_v44  ;;  %v629_v35 = vmul.f32 %v2588_v15, %v611_v36  ;;  %842 = vmatprep.mubr.f32.mxu0 %v707_v17  ;;  %v521_v58 = vadd.f32 %v513_v41, %v473_v45  ;;  %v590_v16 = vadd.f32 %v582_v48, %v542_v61  ;;  %v3489_v17 = vld [vmem:[#allocation27_spill] sm:$0xff] }
 0x1bd   :  { %843 = vmatmul.mubr.f32.vlgmr.msra.gmra.mxu0 %v706_v49  ;;  %v520_v6 = vadd.f32 %v512_v55, %v472_v46  ;;  %v591_v14 = vadd.f32 %v583_v3, %v543_v59  ;;  %v565_v60 = vsel %vm441_vm2, %v3488_v22, %v3487_v43  ;;  %v569_v7 = vsel %vm441_vm2, %v3487_v43, %v3488_v22 }
 0x1be   :  { %v636_v62 = vadd.f32 %v628_v63, %v588_v9  ;;  %v637_v5 = vadd.f32 %v629_v35, %v589_v27  ;;  %v669_v8 = vpop.permute.xlu0 %668  ;;  %v677_v47 = vpop.permute.xlu1 %676  ;;  %v654_v25 = vmul.f32 %v2415_v0, %v3489_v17  ;;  %v655_v36 = vmul.f32 %v2423_v51, %v3490_v30 }
 0x1bf   :  { %v683_v12 = vsel %vm441_vm2, %v669_v8, %v677_v47  ;;  %v687_v1 = vsel %vm441_vm2, %v677_v47, %v669_v8  ;;  %v545_v39 = vadd.f32 %v537_v31, %v521_v58  ;;  %v585_v8 = vmul.f32 %v2440_v24, %v569_v7 }
 0x1c0   :  { %v700_v2 = vmul.f32 %v2610_v42, %v683_v12  ;;  %v701_v4 = vmul.f32 %v2612_v10, %v687_v1  ;;  %v661_v54 = vadd.f32 %v653_v21, %v637_v5  ;;  %v660_v50 = vadd.f32 %v652_v26, %v636_v62 }
 0x1c1   :  { %v544_v26 = vadd.f32 %v536_v37, %v520_v6  ;;  %v584_v5 = vmul.f32 %v2436_v18, %v565_v60  ;;  %v3491_v18 = vld [vmem:[#allocation29_spill] sm:$0xff] }
 0x1c2   :  { %v599_v11 = vpop.permute.xlu0 %598  ;;  %v607_v57 = vpop.permute.xlu1 %606  ;;  %v709_v13 = vadd.f32 %v701_v4, %v661_v54  ;;  %v708_v19 = vadd.f32 %v700_v2, %v660_v50  ;;  %v593_v2 = vadd.f32 %v585_v8, %v545_v39  ;;  %v656_v24 = vmul.f32 %v2415_v0, %v3491_v18  ;;  %v3492_v50 = vld [vmem:[#allocation30_spill] sm:$0xff] }
 0x1c3   :  { %v612_v38 = vsel %vm376_vm1, %v599_v11, %v607_v57  ;;  %v616_v52 = vsel %vm376_vm1, %v607_v57, %v599_v11  ;;  %v592_v1 = vadd.f32 %v584_v5, %v544_v26  ;;  %v657_v53 = vmul.f32 %v2423_v51, %v3492_v50 }
 0x1c4   :  { %v630_v28 = vmul.f32 %v2584_v40, %v616_v52  ;;  %v631_v49 = vmul.f32 %v2588_v15, %v612_v38  ;;  %848 = vmatprep.mubr.f32.mxu0 %v709_v13 }
 0x1c5   :  { %849 = vmatmul.mubr.f32.gmra.mxu0 %v708_v19 }
 0x1c6   :  { %v638_v44 = vadd.f32 %v630_v28, %v590_v16  ;;  %v639_v9 = vadd.f32 %v631_v49, %v591_v14  ;;  %v671_v27 = vpop.permute.xlu0 %670  ;;  %v679_v63 = vpop.permute.xlu1 %678 }
 0x1c7   :  { %v684_v35 = vsel %vm441_vm2, %v671_v27, %v679_v63  ;;  %v688_v32 = vsel %vm441_vm2, %v679_v63, %v671_v27 }
 0x1c8   :  { %v702_v21 = vmul.f32 %v2610_v42, %v684_v35  ;;  %v703_v33 = vmul.f32 %v2612_v10, %v688_v32  ;;  %v663_v56 = vadd.f32 %v655_v36, %v639_v9  ;;  %v662_v62 = vadd.f32 %v654_v25, %v638_v44 }
 0x1ca   :  { %v601_v47 = vpop.permute.xlu0 %600  ;;  %v609_v61 = vpop.permute.xlu1 %608  ;;  %v711_v59 = vadd.f32 %v703_v33, %v663_v56  ;;  %v710_v46 = vadd.f32 %v702_v21, %v662_v62 }
 0x1cb   :  { %v613_v45 = vsel %vm376_vm1, %v601_v47, %v609_v61  ;;  %v617_v12 = vsel %vm376_vm1, %v609_v61, %v601_v47 }
 0x1cc   :  { %v632_v4 = vmul.f32 %v2584_v40, %v617_v12  ;;  %v633_v54 = vmul.f32 %v2588_v15, %v613_v45  ;;  %854 = vmatprep.mubr.f32.mxu0 %v711_v59 }
 0x1cd   :  { %855 = vmatmul.mubr.f32.gmra.mxu0 %v710_v46 }
 0x1ce   :  { %v640_v55 = vadd.f32 %v632_v4, %v592_v1  ;;  %v641_v41 = vadd.f32 %v633_v54, %v593_v2  ;;  %v673_v48 = vpop.permute.xlu0 %672  ;;  %v681_v3 = vpop.permute.xlu1 %680 }
 0x1cf   :  { %v685_v11 = vsel %vm441_vm2, %v673_v48, %v681_v3  ;;  %v689_v40 = vsel %vm441_vm2, %v681_v3, %v673_v48 }
 0x1d0   :  { %v704_v15 = vmul.f32 %v2610_v42, %v685_v11  ;;  %v705_v57 = vmul.f32 %v2612_v10, %v689_v40  ;;  %v665_v13 = vadd.f32 %v657_v53, %v641_v41  ;;  %v664_v19 = vadd.f32 %v656_v24, %v640_v55 }
 0x1d2   :  { %v713_v0 = vadd.f32 %v705_v57, %v665_v13  ;;  %v712_v23 = vadd.f32 %v704_v15, %v664_v19 }
 0x1d4   :  { %860 = vmatprep.mubr.f32.mxu0 %v713_v0 }
 0x1d5   :  { %861 = vmatmul.mubr.f32.gmra.mxu0 %v712_v23 }
 0x27d   :  { %v2710_v51 = vpop.f32.mrf.mxu0 }
 0x27e   :  { %v912_v38 = vmul.f32 %v2710_v51, %v2710_v51 }
 0x27f   :  { %v2712_v37 = vpop.f32.mrf.mxu0 }
 0x280   :  { %v913_v14 = vmul.f32 %v2712_v37, %v2712_v37 }
 0x285   :  { %v2714_v29 = vpop.f32.mrf.mxu0 }
 0x286   :  { %v914_v42 = vmul.f32 %v2714_v29, %v2714_v29  ;;  %v867_v52 = vadd.f32 %v2714_v29, %v2710_v51 }
 0x287   :  { %v2716_v31 = vpop.f32.mrf.mxu0 }
 0x288   :  { %v915_v58 = vmul.f32 %v2716_v31, %v2716_v31  ;;  %v920_v49 = vadd.f32 %v914_v42, %v912_v38  ;;  %v876_v43 = vadd.f32 %v2716_v31, %v2712_v37 }
 0x28a   :  { %v929_v60 = vadd.f32 %v915_v58, %v913_v14 }
 0x28d   :  { %v2718_v6 = vpop.f32.mrf.mxu0 }
 0x28e   :  { %v916_v16 = vmul.f32 %v2718_v6, %v2718_v6  ;;  %v868_v22 = vadd.f32 %v867_v52, %v2718_v6 }
 0x28f   :  { %v2722_v10 = vpop.f32.mrf.mxu0 }
 0x290   :  { %v917_v28 = vmul.f32 %v2722_v10, %v2722_v10  ;;  %v921_v17 = vadd.f32 %v920_v49, %v916_v16  ;;  %v877_v25 = vadd.f32 %v876_v43, %v2722_v10 }
 0x292   :  { %v930_v44 = vadd.f32 %v929_v60, %v917_v28 }
 0x295   :  { %v2739_v7 = vpop.f32.mrf.mxu0 }
 0x296   :  { %v869_v30 = vadd.f32 %v868_v22, %v2739_v7  ;;  %v918_v36 = vmul.f32 %v2739_v7, %v2739_v7 }
 0x297   :  { %v2745_v9 = vpop.f32.mrf.mxu0 }
 0x298   :  { %v870_v27 = vrot.slane %v869_v30, 4  ;;  %v922_v63 = vadd.f32 %v921_v17, %v918_v36  ;;  %v878_v35 = vadd.f32 %v877_v25, %v2745_v9  ;;  %v919_v32 = vmul.f32 %v2745_v9, %v2745_v9 }
 0x29a   :  { %v879_v26 = vrot.slane %v878_v35, 4  ;;  %v931_v39 = vadd.f32 %v930_v44, %v919_v32  ;;  %v871_v21 = vadd.f32 %v870_v27, %v869_v30  ;;  %v923_v33 = vrot.slane %v922_v63, 4 }
 0x29c   :  { %v880_v56 = vadd.f32 %v879_v26, %v878_v35  ;;  %v932_v62 = vrot.slane %v931_v39, 4  ;;  %v872_v5 = vrot.slane %v871_v21, 2  ;;  %v924_v8 = vadd.f32 %v923_v33, %v922_v63 }
 0x29e   :  { %v873_v47 = vadd.f32 %v872_v5, %v871_v21  ;;  %v881_v61 = vrot.slane %v880_v56, 2  ;;  %v925_v59 = vrot.slane %v924_v8, 2  ;;  %v933_v46 = vadd.f32 %v932_v62, %v931_v39 }
 0x2a0   :  { %v874_v45 = vrot.slane %v873_v47, 1  ;;  %v882_v12 = vadd.f32 %v881_v61, %v880_v56  ;;  %v926_v1 = vadd.f32 %v925_v59, %v924_v8  ;;  %v934_v2 = vrot.slane %v933_v46, 2 }
 0x2a2   :  { %v875_v4 = vadd.f32 %v874_v45, %v873_v47  ;;  %v883_v54 = vrot.slane %v882_v12, 1  ;;  %v927_v18 = vrot.slane %v926_v1, 1  ;;  %v935_v24 = vadd.f32 %v934_v2, %v933_v46 }
 0x2a4   :  { %885 = vrot.lane.b32.xlu0 %v875_v4, %s2066_s18  ;;  %v884_v50 = vadd.f32 %v883_v54, %v882_v12  ;;  %v936_v53 = vrot.slane %v935_v24, 1  ;;  %v928_v55 = vadd.f32 %v927_v18, %v926_v1  ;;  %v3493_v12 = vld [vmem:[#allocation35_spill] sm:$0xff] }
 0x2a6   :  { %887 = vrot.lane.b32.xlu1 %v884_v50, %s2066_s18  ;;  %v937_v41 = vadd.f32 %v936_v53, %v935_v24 }
 0x2a8   :  { %938 = vrot.lane.b32.xlu0 %v928_v55, %s2066_s18 }
 0x2aa   :  { %940 = vrot.lane.b32.xlu1 %v937_v41, %s2066_s18 }
 0x316   :  { %v886_v48 = vpop.permute.xlu0 %885 }
 0x318   :  { %v888_v3 = vpop.permute.xlu1 %887 }
 0x319   :  { %v889_v11 = vsel %vm376_vm1, %v886_v48, %v888_v3  ;;  %v890_v40 = vsel %vm376_vm1, %v888_v3, %v886_v48 }
 0x31a   :  { %v891_v15 = vadd.f32 %v890_v40, %v875_v4  ;;  %v892_v57 = vadd.f32 %v889_v11, %v884_v50  ;;  %v939_v13 = vpop.permute.xlu0 %938 }
 0x31c   :  { %893 = vrot.lane.b32.xlu0 %v891_v15, %s2073_s7  ;;  %895 = vrot.lane.b32.xlu1 %v892_v57, %s2073_s7  ;;  %v941_v19 = vpop.permute.xlu1 %940 }
 0x31d   :  { %v942_v0 = vsel %vm376_vm1, %v939_v13, %v941_v19  ;;  %v943_v23 = vsel %vm376_vm1, %v941_v19, %v939_v13 }
 0x31e   :  { %v944_v42 = vadd.f32 %v943_v23, %v928_v55  ;;  %v945_v58 = vadd.f32 %v942_v0, %v937_v41  ;;  %v1882_v23 = vld [vmem:[#allocation6] sm:$0xff] }
 0x320   :  { %946 = vrot.lane.b32.xlu0 %v944_v42, %s2073_s7  ;;  %948 = vrot.lane.b32.xlu1 %v945_v58, %s2073_s7 }
 0x38e   :  { %v894_v38 = vpop.permute.xlu0 %893  ;;  %v896_v52 = vpop.permute.xlu1 %895 }
 0x38f   :  { %v898_v16 = vsel %vm897_vm3, %v894_v38, %v896_v52  ;;  %v899_v14 = vsel %vm897_vm3, %v896_v52, %v894_v38  ;;  %v1884_v38 = vld [vmem:[#allocation6 + $0x10] sm:$0xff]  ;;  %v1885_v52 = vld [vmem:[#allocation6 + $0x18] sm:$0xff] }
 0x390   :  { %v900_v28 = vadd.f32 %v899_v14, %v891_v15  ;;  %v901_v49 = vadd.f32 %v898_v16, %v892_v57  ;;  %v1886_v16 = vld [vmem:[#allocation8] sm:$0xff]  ;;  %v1887_v14 = vld [vmem:[#allocation8 + $0x8] sm:$0xff] }
 0x392   :  { %v947_v43 = vpop.permute.xlu0 %946  ;;  %902 = vrot.lane.b32.xlu0 %v900_v28, %s2074_s19  ;;  %904 = vrot.lane.b32.xlu1 %v901_v49, %s2074_s19  ;;  %v949_v22 = vpop.permute.xlu1 %948 }
 0x393   :  { %v950_v60 = vsel %vm897_vm3, %v947_v43, %v949_v22  ;;  %v951_v17 = vsel %vm897_vm3, %v949_v22, %v947_v43  ;;  %v1566_v43 = vld [vmem:[#allocation14 + $0xf8] sm:$0xff]  ;;  %v1565_v22 = vld [vmem:[#allocation14 + $0xf0] sm:$0xff] }
 0x394   :  { %v952_v25 = vadd.f32 %v951_v17, %v944_v42  ;;  %v953_v30 = vadd.f32 %v950_v60, %v945_v58  ;;  %v3494_v42 = vmov 0.0   ;;  %v1883_v58 = vld [vmem:[#allocation6 + $0x8] sm:$0xff]  ;;  %v1563_v17 = vld [vmem:[#allocation14 + $0xe0] sm:$0xff] }
 0x395   :  { %v1564_v60 = vld [vmem:[#allocation14 + $0xe8] sm:$0xff] }
 0x396   :  { %954 = vrot.lane.b32.xlu0 %v952_v25, %s2074_s19  ;;  %956 = vrot.lane.b32.xlu1 %v953_v30, %s2074_s19 }
 0x404   :  { %v903_v36 = vpop.permute.xlu0 %902  ;;  %v905_v44 = vpop.permute.xlu1 %904 }
 0x405   :  { %v907_v27 = vsel %vm906_vm4, %v903_v36, %v905_v44  ;;  %v908_v63 = vsel %vm906_vm4, %v905_v44, %v903_v36  ;;  %v1560_v36 = vld [vmem:[#allocation14 + $0xc8] sm:$0xff]  ;;  %v1559_v44 = vld [vmem:[#allocation14 + $0xc0] sm:$0xff] }
 0x406   :  { %v909_v35 = vadd.f32 %v908_v63, %v900_v28  ;;  %v910_v32 = vadd.f32 %v907_v27, %v901_v49  ;;  %v1888_v28 = vld [vmem:[#allocation8 + $0x10] sm:$0xff]  ;;  %v1889_v49 = vld [vmem:[#allocation8 + $0x18] sm:$0xff] }
 0x407   :  { %v1558_v27 = vld [vmem:[#allocation14 + $0xb8] sm:$0xff]  ;;  %v1557_v63 = vld [vmem:[#allocation14 + $0xb0] sm:$0xff] }
 0x408   :  { %v911_v26 = vadd.f32 %v910_v32, %v909_v35  ;;  %v955_v39 = vpop.permute.xlu0 %954  ;;  %v957_v21 = vpop.permute.xlu1 %956  ;;  %v1556_v35 = vld [vmem:[#allocation14 + $0xa8] sm:$0xff]  ;;  %v1555_v32 = vld [vmem:[#allocation14 + $0xa0] sm:$0xff] }
 0x409   :  { %v958_v33 = vsel %vm906_vm4, %v955_v39, %v957_v21  ;;  %v959_v56 = vsel %vm906_vm4, %v957_v21, %v955_v39  ;;  %v1553_v39 = vld [vmem:[#allocation14 + $0x90] sm:$0xff]  ;;  %v1552_v21 = vld [vmem:[#allocation14 + $0x88] sm:$0xff] }
 0x40a   :  { %v963_v62 = vmul.f32 0.001953125, %v911_v26  ;;  %v960_v5 = vadd.f32 %v959_v56, %v952_v25  ;;  %v961_v8 = vadd.f32 %v958_v33, %v953_v30  ;;  %v1562_v25 = vld [vmem:[#allocation14 + $0xd8] sm:$0xff]  ;;  %v1561_v30 = vld [vmem:[#allocation14 + $0xd0] sm:$0xff]  ;;  %v1551_v33 = vld [vmem:[#allocation14 + $0x80] sm:$0xff] }
 0x40b   :  { %v1554_v26 = vld [vmem:[#allocation14 + $0x98] sm:$0xff] }
 0x40c   :  { %v962_v47 = vadd.f32 %v961_v8, %v960_v5  ;;  %v965_v61 = vmul.f32 %v963_v62, %v963_v62  ;;  %v970_v1 = vrot.slane %v963_v62, %v3493_v12  ;;  %v1550_v56 = vld [vmem:[#allocation14 + $0x78] sm:$0xff]  ;;  %v1549_v62 = vld [vmem:[#allocation14 + $0x70] sm:$0xff]  ;;  %v1548_v5 = vld [vmem:[#allocation14 + $0x68] sm:$0xff] }
 0x40d   :  { %v1547_v8 = vld [vmem:[#allocation14 + $0x60] sm:$0xff] }
 0x40e   :  { %v964_v59 = vmul.f32 0.001953125, %v962_v47  ;;  %v978_v4 = vsub.f32 %v2745_v9, %v970_v1  ;;  %v972_v18 = vsub.f32 %v2712_v37, %v970_v1  ;;  %v971_v24 = vsub.f32 %v2710_v51, %v970_v1  ;;  %v1546_v47 = vld [vmem:[#allocation14 + $0x58] sm:$0xff] }
 0x40f   :  { %v977_v50 = vsub.f32 %v2739_v7, %v970_v1  ;;  %v976_v53 = vsub.f32 %v2722_v10, %v970_v1  ;;  %v975_v55 = vsub.f32 %v2718_v6, %v970_v1  ;;  %v974_v41 = vsub.f32 %v2716_v31, %v970_v1 }
 0x410   :  { %v966_v46 = vsub.f32 %v964_v59, %v965_v61  ;;  %v973_v13 = vsub.f32 %v2714_v29, %v970_v1  ;;  %v1545_v61 = vld [vmem:[#allocation14 + $0x50] sm:$0xff]  ;;  %v1544_v59 = vld [vmem:[#allocation14 + $0x48] sm:$0xff] }
 0x411   :  { %v1541_v1 = vld [vmem:[#allocation14 + $0x30] sm:$0xff] }
 0x412   :  { %v979_v45 = vadd.f32 1e-05, %v966_v46  ;;  %v1543_v46 = vld [vmem:[#allocation14 + $0x40] sm:$0xff] }
 0x414   :  { %1878 = vrsqrt.f32 %v979_v45  ;;  %v1542_v45 = vld [vmem:[#allocation14 + $0x38] sm:$0xff] }
 0x421   :  { %v1879_v2 = vpop.eup %1878 }
 0x422   :  { %v984_v54 = vrot.slane %v1879_v2, %v3493_v12  ;;  %v1540_v2 = vld [vmem:[#allocation14 + $0x28] sm:$0xff] }
 0x424   :  { %v992_v48 = vmul.f32 %v984_v54, %v978_v4  ;;  %v986_v3 = vmul.f32 %v984_v54, %v972_v18  ;;  %v985_v11 = vmul.f32 %v984_v54, %v971_v24  ;;  %v991_v40 = vmul.f32 %v984_v54, %v977_v50  ;;  %v1539_v4 = vld [vmem:[#allocation14 + $0x20] sm:$0xff]  ;;  %v1537_v18 = vld [vmem:[#allocation14 + $0x10] sm:$0xff]  ;;  %v1536_v24 = vld [vmem:[#allocation14 + $0x8] sm:$0xff] }
 0x425   :  { %v990_v15 = vmul.f32 %v984_v54, %v976_v53  ;;  %v989_v9 = vmul.f32 %v984_v54, %v975_v55  ;;  %v988_v57 = vmul.f32 %v984_v54, %v974_v41  ;;  %v987_v6 = vmul.f32 %v984_v54, %v973_v13  ;;  %v1538_v54 = vld [vmem:[#allocation14 + $0x18] sm:$0xff]  ;;  %v1535_v53 = vld [vmem:[#allocation14] sm:$0xff]  ;;  %v1597_v41 = vld [vmem:[#allocation14 + $0x1f0] sm:$0xff] }
 0x426   :  { %v2798_v37 = vmax.f32 %v992_v48, 0.0  ;;  %v2800_v51 = vmax.f32 %v986_v3, 0.0  ;;  %v2802_v7 = vmax.f32 %v985_v11, 0.0  ;;  %v2804_v10 = vmax.f32 %v991_v40, 0.0  ;;  %v1598_v55 = vld [vmem:[#allocation14 + $0x1f8] sm:$0xff]  ;;  %v1596_v3 = vld [vmem:[#allocation14 + $0x1e8] sm:$0xff] }
 0x427   :  { %v2809_v31 = vmax.f32 %v990_v15, 0.0  ;;  %v2814_v29 = vmax.f32 %v989_v9, 0.0  ;;  %v2817_v19 = vmax.f32 %v988_v57, 0.0  ;;  %v2820_v0 = vmax.f32 %v987_v6, 0.0  ;;  %v1595_v11 = vld [vmem:[#allocation14 + $0x1e0] sm:$0xff]  ;;  %v1594_v40 = vld [vmem:[#allocation14 + $0x1d8] sm:$0xff] }
 0x428   :  { %1029 = vmatprep.subr.mxu1 %v2798_v37  ;;  %1303 = vrot.lane.b32.xlu1 %v2800_v51, %s2066_s18  ;;  %v1593_v15 = vld [vmem:[#allocation14 + $0x1d0] sm:$0xff]  ;;  %v1592_v57 = vld [vmem:[#allocation14 + $0x1c8] sm:$0xff]  ;;  %v1591_v13 = vld [vmem:[#allocation14 + $0x1c0] sm:$0xff] }
 0x429   :  { %1295 = vrot.lane.b32.xlu0 %v2802_v7, %s2066_s18  ;;  %1030 = vmatpush1.msra.mxu1 %v2804_v10  ;;  %v1590_v6 = vld [vmem:[#allocation14 + $0x1b8] sm:$0xff] }
 0x42a   :  { %1031 = vmatprep.subr.mxu1 %v2809_v31 }
 0x42b   :  { %1032 = vmatpush1.msra.mxu1 %v2814_v29 }
 0x42c   :  { %1033 = vmatprep.subr.mxu1 %v2817_v19  ;;  %1305 = vrot.lane.b32.xlu1 %v2817_v19, %s2066_s18 }
 0x42d   :  { %1297 = vrot.lane.b32.xlu0 %v2820_v0, %s2066_s18  ;;  %1034 = vmatpush1.msra.mxu1 %v2820_v0 }
 0x42e   :  { %1035 = vmatprep.subr.mxu1 %v2800_v51 }
 0x42f   :  { %1036 = vmatpush1.msra.mxu1 %v2802_v7 }
 0x430   :  { %1375 = vrot.lane.b32.xlu1 %v2800_v51, %s2072_s5  ;;  %1852 = vmatmul.mubr.msk.f32.vlgmr.msra.gmra.mxu1 %vm155_vm0, %v1882_v23  ;;  %v1589_v23 = vld [vmem:[#allocation14 + $0x1b0] sm:$0xff] }
 0x431   :  { %1367 = vrot.lane.b32.xlu0 %v2802_v7, %s2072_s5  ;;  %1118 = vmatprep.subr.mxu1 %v2798_v37 }
 0x432   :  { %1119 = vmatpush1.msra.mxu1 %v2804_v10  ;;  %1075 = vmatprep.mubr.f32.mxu1 %v3494_v42 }
 0x433   :  { %1120 = vmatprep.subr.mxu1 %v2809_v31 }
 0x434   :  { %1121 = vmatpush1.msra.mxu1 %v2814_v29  ;;  %1307 = vrot.lane.b32.xlu1 %v2809_v31, %s2066_s18 }
 0x435   :  { %1299 = vrot.lane.b32.xlu0 %v2814_v29, %s2066_s18  ;;  %1122 = vmatprep.subr.mxu1 %v2817_v19 }
 0x436   :  { %1123 = vmatpush1.msra.mxu1 %v2820_v0 }
 0x437   :  { %1853 = vmatmul.mubr.msk.f32.gmra.mxu1 %vm155_vm0, %v1883_v58  ;;  %1124 = vmatprep.subr.mxu1 %v2800_v51  ;;  %v1588_v58 = vld [vmem:[#allocation14 + $0x1a8] sm:$0xff] }
 0x438   :  { %1125 = vmatpush1.msra.mxu1 %v2802_v7  ;;  %1377 = vrot.lane.b32.xlu1 %v2817_v19, %s2072_s5 }
 0x439   :  { %1369 = vrot.lane.b32.xlu0 %v2820_v0, %s2072_s5  ;;  %1081 = vmatprep.mubr.f32.mxu1 %v3494_v42 }
 0x43a   :  { %1599 = vmatprep.subr.mxu1 %v1566_v43  ;;  %v1582_v43 = vld [vmem:[#allocation14 + $0x178] sm:$0xff] }
 0x43b   :  { %1854 = vmatmul.mubr.msk.f32.gmra.mxu1 %vm155_vm0, %v1884_v38  ;;  %v1587_v38 = vld [vmem:[#allocation14 + $0x1a0] sm:$0xff] }
 0x43c   :  { %1309 = vrot.lane.b32.xlu1 %v2798_v37, %s2066_s18  ;;  %1087 = vmatprep.mubr.f32.mxu1 %v3494_v42 }
 0x43d   :  { %1301 = vrot.lane.b32.xlu0 %v2804_v10, %s2066_s18 }
 0x43f   :  { %1855 = vmatmul.mubr.msk.f32.gmra.mxu1 %vm155_vm0, %v1885_v52  ;;  %v1586_v52 = vld [vmem:[#allocation14 + $0x198] sm:$0xff] }
 0x440   :  { %1379 = vrot.lane.b32.xlu1 %v2809_v31, %s2072_s5  ;;  %1158 = vmatprep.mubr.f32.mxu1 %v3494_v42 }
 0x441   :  { %1371 = vrot.lane.b32.xlu0 %v2814_v29, %s2072_s5 }
 0x443   :  { %1856 = vmatmul.mubr.msk.f32.vlgmr.msra.gmra.mxu1 %vm155_vm0, %v1886_v16 }
 0x444   :  { %1381 = vrot.lane.b32.xlu1 %v2798_v37, %s2072_s5  ;;  %1164 = vmatprep.mubr.f32.mxu1 %v3494_v42 }
 0x445   :  { %1373 = vrot.lane.b32.xlu0 %v2804_v10, %s2072_s5  ;;  %1600 = vmatpush1.msra.mxu1 %v1565_v22  ;;  %v1581_v22 = vld [vmem:[#allocation14 + $0x170] sm:$0xff] }
 0x446   :  { %1601 = vmatprep.subr.mxu1 %v1564_v60 }
 0x447   :  { %1857 = vmatmul.mubr.msk.f32.gmra.mxu1 %vm155_vm0, %v1887_v14  ;;  %v1585_v14 = vld [vmem:[#allocation14 + $0x190] sm:$0xff] }
 0x448   :  { %1170 = vmatprep.mubr.f32.mxu1 %v3494_v42  ;;  %1602 = vmatpush1.msra.mxu1 %v1563_v17  ;;  %v1580_v17 = vld [vmem:[#allocation14 + $0x168] sm:$0xff] }
 0x449   :  { %1603 = vmatprep.subr.mxu1 %v1562_v25  ;;  %v1579_v25 = vld [vmem:[#allocation14 + $0x160] sm:$0xff] }
 0x44a   :  { %1604 = vmatpush1.msra.mxu1 %v1561_v30  ;;  %v1578_v30 = vld [vmem:[#allocation14 + $0x158] sm:$0xff] }
 0x44b   :  { %1858 = vmatmul.mubr.msk.f32.gmra.mxu1 %vm155_vm0, %v1888_v28  ;;  %1605 = vmatprep.subr.mxu1 %v1560_v36  ;;  %v1584_v28 = vld [vmem:[#allocation14 + $0x188] sm:$0xff] }
 0x44c   :  { %1176 = vmatprep.mubr.f32.mxu1 %v3494_v42  ;;  %1606 = vmatpush1.msra.mxu1 %v1559_v44  ;;  %v1577_v44 = vld [vmem:[#allocation14 + $0x150] sm:$0xff] }
 0x44d   :  { %1607 = vmatprep.subr.mxu1 %v1558_v27  ;;  %v1576_v27 = vld [vmem:[#allocation14 + $0x148] sm:$0xff] }
 0x44e   :  { %1608 = vmatpush1.msra.mxu1 %v1557_v63  ;;  %v1575_v63 = vld [vmem:[#allocation14 + $0x140] sm:$0xff] }
 0x44f   :  { %1859 = vmatmul.mubr.msk.f32.gmra.mxu1 %vm155_vm0, %v1889_v49  ;;  %1609 = vmatprep.subr.mxu1 %v1556_v35  ;;  %v1583_v49 = vld [vmem:[#allocation14 + $0x180] sm:$0xff]  ;;  %v1574_v35 = vld [vmem:[#allocation14 + $0x138] sm:$0xff] }
 0x450   :  { %1610 = vmatpush1.msra.mxu1 %v1555_v32  ;;  %v1573_v32 = vld [vmem:[#allocation14 + $0x130] sm:$0xff] }
 0x451   :  { %1611 = vmatprep.subr.mxu1 %v1554_v26 }
 0x452   :  { %1612 = vmatpush1.msra.mxu1 %v1553_v39  ;;  %v1572_v39 = vld [vmem:[#allocation14 + $0x128] sm:$0xff] }
 0x453   :  { %1613 = vmatprep.subr.mxu1 %v1552_v21  ;;  %v1571_v21 = vld [vmem:[#allocation14 + $0x120] sm:$0xff] }
 0x454   :  { %1614 = vmatpush1.msra.mxu1 %v1551_v33  ;;  %v1570_v33 = vld [vmem:[#allocation14 + $0x118] sm:$0xff] }
 0x455   :  { %1615 = vmatprep.subr.mxu1 %v1550_v56  ;;  %v1569_v56 = vld [vmem:[#allocation14 + $0x110] sm:$0xff] }
 0x456   :  { %1616 = vmatpush1.msra.mxu1 %v1549_v62 }
 0x457   :  { %1617 = vmatprep.subr.mxu1 %v1548_v5  ;;  %v1568_v5 = vld [vmem:[#allocation14 + $0x108] sm:$0xff] }
 0x458   :  { %1618 = vmatpush1.msra.mxu1 %v1547_v8  ;;  %v1567_v8 = vld [vmem:[#allocation14 + $0x100] sm:$0xff] }
 0x459   :  { %1619 = vmatprep.subr.mxu1 %v1546_v47 }
 0x45a   :  { %1620 = vmatpush1.msra.mxu1 %v1545_v61 }
 0x45b   :  { %1621 = vmatprep.subr.mxu1 %v1544_v59 }
 0x45c   :  { %1622 = vmatpush1.msra.mxu1 %v1543_v46 }
 0x45d   :  { %1623 = vmatprep.subr.mxu1 %v1542_v45 }
 0x45e   :  { %1624 = vmatpush1.msra.mxu1 %v1541_v1 }
 0x45f   :  { %1625 = vmatprep.subr.mxu1 %v1540_v2 }
 0x460   :  { %1626 = vmatpush1.msra.mxu1 %v1539_v4 }
 0x461   :  { %1627 = vmatprep.subr.mxu1 %v1538_v54 }
 0x462   :  { %1628 = vmatpush1.msra.mxu1 %v1537_v18 }
 0x463   :  { %1629 = vmatprep.subr.mxu1 %v1536_v24 }
 0x464   :  { %1630 = vmatpush1.msra.mxu1 %v1535_v53 }
 0x465   :  { %1631 = vmatprep.subr.mxu1 %v1598_v55 }
 0x466   :  { %1632 = vmatpush2.msra.mxu1 %v1597_v41 }
 0x467   :  { %1633 = vmatprep.subr.mxu1 %v1596_v3 }
 0x468   :  { %1634 = vmatpush2.msra.mxu1 %v1595_v11 }
 0x469   :  { %1635 = vmatprep.subr.mxu1 %v1594_v40 }
 0x46a   :  { %1636 = vmatpush2.msra.mxu1 %v1593_v15 }
 0x46b   :  { %1637 = vmatprep.subr.mxu1 %v1592_v57 }
 0x46c   :  { %1638 = vmatpush2.msra.mxu1 %v1591_v13 }
 0x46d   :  { %1639 = vmatprep.subr.mxu1 %v1590_v6 }
 0x46e   :  { %1640 = vmatpush2.msra.mxu1 %v1589_v23 }
 0x46f   :  { %1641 = vmatprep.subr.mxu1 %v1588_v58 }
 0x470   :  { %1642 = vmatpush2.msra.mxu1 %v1587_v38  ;;  %v3001_v38 = vld [vmem:[#allocation12] sm:$0xff] }
 0x471   :  { %1643 = vmatprep.subr.mxu1 %v1586_v52  ;;  %v3003_v52 = vld [vmem:[#allocation12 + $0x8] sm:$0xff] }
 0x472   :  { %1644 = vmatpush2.msra.mxu1 %v1585_v14 }
 0x473   :  { %1645 = vmatprep.subr.mxu1 %v1584_v28  ;;  %v3007_v28 = vrot.slane %v3001_v38, %v3493_v12 }
 0x474   :  { %1646 = vmatpush2.msra.mxu1 %v1583_v49  ;;  %v3011_v49 = vrot.slane %v3003_v52, %v3493_v12 }
 0x475   :  { %1647 = vmatprep.subr.mxu1 %v1582_v43  ;;  %v3502_v43 = vld [vmem:[#allocation33_spill] sm:$0xff] }
 0x476   :  { %1648 = vmatpush2.msra.mxu1 %v1581_v22  ;;  %v3015_v22 = vrot.slane %v3001_v38, %v3502_v43 }
 0x477   :  { %1649 = vmatprep.subr.mxu1 %v1580_v17  ;;  %v3019_v17 = vrot.slane %v3003_v52, %v3502_v43 }
 0x478   :  { %1650 = vmatpush2.msra.mxu1 %v1579_v25 }
 0x479   :  { %1651 = vmatprep.subr.mxu1 %v1578_v30 }
 0x47a   :  { %1652 = vmatpush2.msra.mxu1 %v1577_v44 }
 0x47b   :  { %1653 = vmatprep.subr.mxu1 %v1576_v27 }
 0x47c   :  { %1654 = vmatpush2.msra.mxu1 %v1575_v63 }
 0x47d   :  { %1655 = vmatprep.subr.mxu1 %v1574_v35 }
 0x47e   :  { %1656 = vmatpush2.msra.mxu1 %v1573_v32  ;;  %v3503_v32 = vld [vmem:[#allocation39_spill] sm:$0xff] }
 0x47f   :  { %1657 = vmatprep.subr.mxu1 %v1572_v39  ;;  %v3029_v39 = vrot.slane %v3001_v38, %v3503_v32 }
 0x480   :  { %1658 = vmatpush2.msra.mxu1 %v1571_v21  ;;  %v3033_v21 = vrot.slane %v3003_v52, %v3503_v32 }
 0x481   :  { %1659 = vmatprep.subr.mxu1 %v1570_v33  ;;  %v3504_v33 = vld [vmem:[#allocation40_spill] sm:$0xff] }
 0x482   :  { %1660 = vmatpush2.msra.mxu1 %v1569_v56  ;;  %v3037_v56 = vrot.slane %v3001_v38, %v3504_v33 }
 0x483   :  { %1661 = vmatprep.subr.mxu1 %v1568_v5  ;;  %v3041_v5 = vrot.slane %v3003_v52, %v3504_v33 }
 0x484   :  { %1662 = vmatpush2.msra.mxu1 %v1567_v8  ;;  %v3505_v8 = vld [vmem:[#allocation34_spill] sm:$0xff] }
 0x485   :  { %v3049_v43 = vrot.slane %v3003_v52, %v3505_v8 }
 0x49a   :  { %v1304_v54 = vpop.permute.xlu1 %1303 }
 0x49b   :  { %v1296_v4 = vpop.permute.xlu0 %1295 }
 0x49c   :  { %v1311_v32 = vsel %vm376_vm1, %v1296_v4, %v1304_v54  ;;  %v1315_v33 = vsel %vm376_vm1, %v1304_v54, %v1296_v4 }
 0x49e   :  { %v2975_v24 = vpop.permute.xlu1 %1305 }
 0x49f   :  { %v2973_v18 = vpop.permute.xlu0 %1297 }
 0x4a2   :  { %v2979_v55 = vpop.permute.xlu1 %1375 }
 0x4a3   :  { %v2977_v53 = vpop.permute.xlu0 %1367 }
 0x4a6   :  { %v2983_v3 = vpop.permute.xlu1 %1307 }
 0x4a7   :  { %v2981_v41 = vpop.permute.xlu0 %1299 }
 0x4aa   :  { %v2987_v40 = vpop.permute.xlu1 %1377 }
 0x4ab   :  { %v2985_v11 = vpop.permute.xlu0 %1369 }
 0x4ae   :  { %v2991_v57 = vpop.permute.xlu1 %1309 }
 0x4af   :  { %v2989_v15 = vpop.permute.xlu0 %1301 }
 0x4b2   :  { %v2995_v6 = vpop.permute.xlu1 %1379 }
 0x4b3   :  { %v2993_v13 = vpop.permute.xlu0 %1371 }
 0x4b4   :  { %3499 = vst [vmem:[#allocation26_spill] sm:$0xff] %v2993_v13 }
 0x4b6   :  { %v2999_v58 = vpop.permute.xlu1 %1381 }
 0x4b7   :  { %v2997_v23 = vpop.permute.xlu0 %1373  ;;  %3501 = vst [vmem:[#allocation22_spill] sm:$0xff] %v2999_v58 }
 0x4b8   :  { %3500 = vst [vmem:[#allocation37_spill] sm:$0xff] %v2997_v23 }
 0x4f0   :  { %v2877_v50 = vpop.f32.mrf.mxu1 }
 0x4f1   :  { %1183 = vrot.lane.b32.xlu0 %v2877_v50, %s2066_s18 }
 0x4f2   :  { %v2881_v48 = vpop.f32.mrf.mxu1 }
 0x4f3   :  { %1191 = vrot.lane.b32.xlu1 %v2881_v48, %s2066_s18 }
 0x4f5   :  { %1247 = vrot.lane.b32.xlu0 %v2877_v50, %s2072_s5 }
 0x4f7   :  { %v2887_v9 = vpop.f32.mrf.mxu1  ;;  %1255 = vrot.lane.b32.xlu1 %v2881_v48, %s2072_s5 }
 0x4f9   :  { %1185 = vrot.lane.b32.xlu0 %v2887_v9, %s2066_s18  ;;  %v2893_v42 = vpop.f32.mrf.mxu1 }
 0x4fb   :  { %1193 = vrot.lane.b32.xlu1 %v2893_v42, %s2066_s18  ;;  %v2899_v16 = vpop.f32.mrf.mxu1 }
 0x4fd   :  { %1249 = vrot.lane.b32.xlu0 %v2887_v9, %s2072_s5  ;;  %v2905_v60 = vpop.f32.mrf.mxu1 }
 0x4ff   :  { %1257 = vrot.lane.b32.xlu1 %v2893_v42, %s2072_s5  ;;  %v2911_v36 = vpop.f32.mrf.mxu1 }
 0x501   :  { %1187 = vrot.lane.b32.xlu0 %v2899_v16, %s2066_s18  ;;  %v2917_v26 = vpop.f32.mrf.mxu1 }
 0x503   :  { %1195 = vrot.lane.b32.xlu1 %v2905_v60, %s2066_s18  ;;  %v2923_v62 = vpop.f32.mrf.mxu1 }
 0x505   :  { %1251 = vrot.lane.b32.xlu0 %v2899_v16, %s2072_s5  ;;  %v2929_v47 = vpop.f32.mrf.mxu1 }
 0x507   :  { %1259 = vrot.lane.b32.xlu1 %v2905_v60, %s2072_s5  ;;  %v2935_v61 = vpop.f32.mrf.mxu1 }
 0x509   :  { %1189 = vrot.lane.b32.xlu0 %v2911_v36, %s2066_s18  ;;  %v2941_v59 = vpop.f32.mrf.mxu1 }
 0x50b   :  { %1197 = vrot.lane.b32.xlu1 %v2917_v26, %s2066_s18  ;;  %v2947_v46 = vpop.f32.mrf.mxu1 }
 0x50c   :  { %3495 = vst [vmem:[#allocation24_spill] sm:$0xff] %v2947_v46 }
 0x50d   :  { %1253 = vrot.lane.b32.xlu0 %v2911_v36, %s2072_s5  ;;  %v2953_v45 = vpop.f32.mrf.mxu1 }
 0x50e   :  { %3496 = vst [vmem:[#allocation23_spill] sm:$0xff] %v2953_v45 }
 0x50f   :  { %1261 = vrot.lane.b32.xlu1 %v2917_v26, %s2072_s5  ;;  %v2959_v1 = vpop.f32.mrf.mxu1 }
 0x510   :  { %3497 = vst [vmem:[#allocation41_spill] sm:$0xff] %v2959_v1 }
 0x511   :  { %1415 = vrot.lane.b32.xlu0 %v2923_v62, %s2066_s18  ;;  %v2965_v2 = vpop.f32.mrf.mxu1 }
 0x512   :  { %3498 = vst [vmem:[#allocation25_spill] sm:$0xff] %v2965_v2 }
 0x513   :  { %1423 = vrot.lane.b32.xlu1 %v2929_v47, %s2066_s18 }
 0x515   :  { %1487 = vrot.lane.b32.xlu0 %v2923_v62, %s2072_s5 }
 0x517   :  { %1495 = vrot.lane.b32.xlu1 %v2929_v47, %s2072_s5 }
 0x519   :  { %1417 = vrot.lane.b32.xlu0 %v2935_v61, %s2066_s18 }
 0x51b   :  { %1425 = vrot.lane.b32.xlu1 %v2941_v59, %s2066_s18 }
 0x51d   :  { %1489 = vrot.lane.b32.xlu0 %v2935_v61, %s2072_s5 }
 0x51f   :  { %1497 = vrot.lane.b32.xlu1 %v2941_v59, %s2072_s5 }
 0x521   :  { %1419 = vrot.lane.b32.xlu0 %v2947_v46, %s2066_s18 }
 0x523   :  { %1427 = vrot.lane.b32.xlu1 %v2953_v45, %s2066_s18 }
 0x525   :  { %1491 = vrot.lane.b32.xlu0 %v2947_v46, %s2072_s5 }
 0x527   :  { %1499 = vrot.lane.b32.xlu1 %v2953_v45, %s2072_s5  ;;  %v1328_v45 = vmul.f32 %v3049_v43, %v1311_v32 }
 0x529   :  { %1421 = vrot.lane.b32.xlu0 %v2959_v1, %s2066_s18 }
 0x52b   :  { %1429 = vrot.lane.b32.xlu1 %v2965_v2, %s2066_s18 }
 0x52d   :  { %1493 = vrot.lane.b32.xlu0 %v2959_v1, %s2072_s5 }
 0x52f   :  { %1501 = vrot.lane.b32.xlu1 %v2965_v2, %s2072_s5 }
 0x563   :  { %v1184_v14 = vpop.permute.xlu0 %1183 }
 0x565   :  { %v1192_v25 = vpop.permute.xlu1 %1191 }
 0x566   :  { %v1199_v30 = vsel %vm376_vm1, %v1184_v14, %v1192_v25  ;;  %v1203_v44 = vsel %vm376_vm1, %v1192_v25, %v1184_v14  ;;  %v3045_v14 = vrot.slane %v3001_v38, %v3505_v8  ;;  %v1231_v25 = vmul.f32 %v3015_v22, %v2877_v50 }
 0x567   :  { %v1215_v27 = vmul.f32 %v3007_v28, %v1203_v44  ;;  %v1216_v63 = vmul.f32 %v3011_v49, %v1199_v30  ;;  %v1248_v35 = vpop.permute.xlu0 %1247  ;;  %v1232_v30 = vmul.f32 %v3019_v17, %v2881_v48 }
 0x568   :  { %v1327_v58 = vmul.f32 %v3045_v14, %v1315_v33 }
 0x569   :  { %v1256_v44 = vpop.permute.xlu1 %1255  ;;  %v1239_v2 = vadd.f32 %v1231_v25, %v1215_v27  ;;  %v1240_v1 = vadd.f32 %v1232_v30, %v1216_v63  ;;  %v1351_v27 = vmul.f32 %v3037_v56, %v2802_v7 }
 0x56a   :  { %v1263_v12 = vsel %vm441_vm2, %v1248_v35, %v1256_v44  ;;  %v1267_v8 = vsel %vm441_vm2, %v1256_v44, %v1248_v35  ;;  %v1234_v44 = vmul.f32 %v3019_v17, %v2893_v42 }
 0x56b   :  { %v1279_v50 = vmul.f32 %v3029_v39, %v1263_v12  ;;  %v1280_v23 = vmul.f32 %v3033_v21, %v1267_v8  ;;  %v1186_v48 = vpop.permute.xlu0 %1185  ;;  %v1352_v12 = vmul.f32 %v3041_v5, %v2800_v51  ;;  %v1312_v51 = vsel %vm376_vm1, %v2973_v18, %v2975_v24 }
 0x56d   :  { %v1287_v46 = vadd.f32 %v1279_v50, %v1239_v2  ;;  %v1288_v13 = vadd.f32 %v1280_v23, %v1240_v1  ;;  %v1194_v4 = vpop.permute.xlu1 %1193  ;;  %v1233_v23 = vmul.f32 %v3015_v22, %v2887_v9 }
 0x56e   :  { %v1200_v54 = vsel %vm376_vm1, %v1186_v48, %v1194_v4  ;;  %v1204_v35 = vsel %vm376_vm1, %v1194_v4, %v1186_v48  ;;  %v1330_v4 = vmul.f32 %v3049_v43, %v1312_v51 }
 0x56f   :  { %v1335_v63 = vadd.f32 %v1327_v58, %v1287_v46  ;;  %v1336_v25 = vadd.f32 %v1328_v45, %v1288_v13  ;;  %v1217_v30 = vmul.f32 %v3007_v28, %v1204_v35  ;;  %v1218_v2 = vmul.f32 %v3011_v49, %v1200_v54  ;;  %v1250_v1 = vpop.permute.xlu0 %1249 }
 0x570   :  { %v1316_v46 = vsel %vm376_vm1, %v2975_v24, %v2973_v18 }
 0x571   :  { %v1258_v32 = vpop.permute.xlu1 %1257  ;;  %v3081_v33 = vadd.f32 %v1351_v27, %v1335_v63  ;;  %v3083_v7 = vadd.f32 %v1352_v12, %v1336_v25  ;;  %v1241_v45 = vadd.f32 %v1233_v23, %v1217_v30  ;;  %v1242_v13 = vadd.f32 %v1234_v44, %v1218_v2 }
 0x572   :  { %v1264_v9 = vsel %vm441_vm2, %v1250_v1, %v1258_v32  ;;  %v1268_v42 = vsel %vm441_vm2, %v1258_v32, %v1250_v1  ;;  %v1329_v48 = vmul.f32 %v3045_v14, %v1316_v46  ;;  %v1353_v12 = vmul.f32 %v3037_v56, %v2820_v0 }
 0x573   :  { %v1281_v58 = vmul.f32 %v3029_v39, %v1264_v9  ;;  %v1282_v8 = vmul.f32 %v3033_v21, %v1268_v42  ;;  %v1188_v50 = vpop.permute.xlu0 %1187  ;;  %v1354_v63 = vmul.f32 %v3041_v5, %v2817_v19  ;;  %v1235_v44 = vmul.f32 %v3015_v22, %v2899_v16 }
 0x574   :  { %v1236_v32 = vmul.f32 %v3019_v17, %v2905_v60  ;;  %v1313_v19 = vsel %vm376_vm1, %v2981_v41, %v2983_v3  ;;  %v1317_v9 = vsel %vm376_vm1, %v2983_v3, %v2981_v41  ;;  %v1355_v3 = vmul.f32 %v3037_v56, %v2814_v29 }
 0x575   :  { %v1289_v54 = vadd.f32 %v1281_v58, %v1241_v45  ;;  %v1290_v35 = vadd.f32 %v1282_v8, %v1242_v13  ;;  %v1196_v18 = vpop.permute.xlu1 %1195  ;;  %v1358_v29 = vmul.f32 %v3041_v5, %v2798_v37  ;;  %v1314_v37 = vsel %vm376_vm1, %v2989_v15, %v2991_v57 }
 0x576   :  { %v1201_v24 = vsel %vm376_vm1, %v1188_v50, %v1196_v18  ;;  %v1205_v27 = vsel %vm376_vm1, %v1196_v18, %v1188_v50  ;;  %v3506_v50 = vld [vmem:[#allocation38_spill] sm:$0xff] }
 0x577   :  { %v1337_v25 = vadd.f32 %v1329_v48, %v1289_v54  ;;  %v1338_v30 = vadd.f32 %v1330_v4, %v1290_v35  ;;  %v1219_v2 = vmul.f32 %v3007_v28, %v1205_v27  ;;  %v1220_v1 = vmul.f32 %v3011_v49, %v1201_v24  ;;  %v1252_v23 = vpop.permute.xlu0 %1251 }
 0x578   :  { %v3135_v48 = vrot.slane %v3001_v38, %v3506_v50  ;;  %v3139_v41 = vrot.slane %v3003_v52, %v3506_v50  ;;  %v1357_v4 = vmul.f32 %v3037_v56, %v2804_v10  ;;  %v1331_v54 = vmul.f32 %v3045_v14, %v1317_v9 }
 0x579   :  { %v1260_v51 = vpop.permute.xlu1 %1259  ;;  %v3115_v46 = vadd.f32 %v1353_v12, %v1337_v25  ;;  %v3117_v0 = vadd.f32 %v1354_v63, %v1338_v30  ;;  %v1243_v42 = vadd.f32 %v1235_v44, %v1219_v2  ;;  %v1244_v45 = vadd.f32 %v1236_v32, %v1220_v1 }
 0x57a   :  { %v1265_v16 = vsel %vm441_vm2, %v1252_v23, %v1260_v51  ;;  %v1269_v60 = vsel %vm441_vm2, %v1260_v51, %v1252_v23  ;;  %v1332_v35 = vmul.f32 %v3049_v43, %v1313_v19  ;;  %v1356_v25 = vmul.f32 %v3041_v5, %v2809_v31 }
 0x57b   :  { %v1283_v13 = vmul.f32 %v3029_v39, %v1265_v16  ;;  %v1284_v58 = vmul.f32 %v3033_v21, %v1269_v60  ;;  %v1190_v8 = vpop.permute.xlu0 %1189  ;;  %v1383_v23 = vsel %vm441_vm2, %v2977_v53, %v2979_v55  ;;  %v1387_v31 = vsel %vm441_vm2, %v2979_v55, %v2977_v53  ;;  %v3507_v60 = vld [vmem:[#allocation36_spill] sm:$0xff] }
 0x57c   :  { %v1238_v5 = vmul.f32 %v3019_v17, %v2917_v26  ;;  %v1399_v9 = vmul.f32 %v3135_v48, %v1383_v23  ;;  %v1400_v16 = vmul.f32 %v3139_v41, %v1387_v31 }
 0x57d   :  { %v1291_v18 = vadd.f32 %v1283_v13, %v1243_v42  ;;  %v1292_v24 = vadd.f32 %v1284_v58, %v1244_v45  ;;  %v1198_v27 = vpop.permute.xlu1 %1197  ;;  %v3199_v42 = vrot.slane %v3001_v38, %v3507_v60  ;;  %v3203_v45 = vrot.slane %v3003_v52, %v3507_v60 }
 0x57e   :  { %v1202_v12 = vsel %vm376_vm1, %v1190_v8, %v1198_v27  ;;  %v1206_v63 = vsel %vm376_vm1, %v1198_v27, %v1190_v8  ;;  %v1334_v13 = vmul.f32 %v3049_v43, %v1314_v37  ;;  %v1407_v8 = vadd.f32 %v1399_v9, %v3081_v33 }
 0x57f   :  { %v1339_v10 = vadd.f32 %v1331_v54, %v1291_v18  ;;  %v1340_v56 = vadd.f32 %v1332_v35, %v1292_v24  ;;  %v1221_v30 = vmul.f32 %v3007_v28, %v1206_v63  ;;  %v1222_v2 = vmul.f32 %v3011_v49, %v1202_v12  ;;  %v1254_v1 = vpop.permute.xlu0 %1253  ;;  %v3221_v24 = vld [vmem:[#allocation12 + $0x18] ss:$0 sm:$0xff] }
 0x580   :  { %v1318_v28 = vsel %vm376_vm1, %v2991_v57, %v2989_v15  ;;  %v1237_v49 = vmul.f32 %v3015_v22, %v2911_v36  ;;  %v3187_v15 = vrot.slane %v3001_v38, %v2550_v34  ;;  %v3191_v36 = vrot.slane %v3003_v52, %v2550_v34 }
 0x581   :  { %v1262_v44 = vpop.permute.xlu1 %1261  ;;  %v3177_v32 = vadd.f32 %v1355_v3, %v1339_v10  ;;  %v3179_v53 = vadd.f32 %v1356_v25, %v1340_v56  ;;  %v1246_v57 = vadd.f32 %v1238_v5, %v1222_v2  ;;  %v1333_v34 = vmul.f32 %v3045_v14, %v1318_v28 }
 0x582   :  { %v1266_v55 = vsel %vm441_vm2, %v1254_v1, %v1262_v44  ;;  %v1270_v51 = vsel %vm441_vm2, %v1262_v44, %v1254_v1  ;;  %v1245_v26 = vadd.f32 %v1237_v49, %v1221_v30  ;;  %v1408_v50 = vadd.f32 %v1400_v16, %v3083_v7  ;;  %v3219_v7 = vld [vmem:[#allocation12 + $0x10] ss:$0 sm:$0xff] }
 0x583   :  { %v1285_v22 = vmul.f32 %v3029_v39, %v1266_v55  ;;  %v1286_v17 = vmul.f32 %v3033_v21, %v1270_v51  ;;  %v1416_v19 = vpop.permute.xlu0 %1415  ;;  %v1471_v18 = vmul.f32 %v3199_v42, %v2923_v62  ;;  %v1472_v33 = vmul.f32 %v3203_v45, %v2929_v47 }
 0x584   :  { %v1384_v56 = vsel %vm441_vm2, %v2985_v11, %v2987_v40  ;;  %v1388_v62 = vsel %vm441_vm2, %v2987_v40, %v2985_v11 }
 0x585   :  { %v1293_v39 = vadd.f32 %v1285_v22, %v1245_v26  ;;  %v1294_v58 = vadd.f32 %v1286_v17, %v1246_v57  ;;  %v1424_v21 = vpop.permute.xlu1 %1423  ;;  %v1401_v31 = vmul.f32 %v3135_v48, %v1384_v56  ;;  %v1402_v37 = vmul.f32 %v3139_v41, %v1388_v62 }
 0x586   :  { %v1431_v3 = vsel %vm376_vm1, %v1416_v19, %v1424_v21  ;;  %v1435_v38 = vsel %vm376_vm1, %v1424_v21, %v1416_v19  ;;  %v1473_v22 = vmul.f32 %v3199_v42, %v2935_v61  ;;  %v1474_v17 = vmul.f32 %v3203_v45, %v2941_v59 }
 0x587   :  { %v1341_v54 = vadd.f32 %v1333_v34, %v1293_v39  ;;  %v1342_v52 = vadd.f32 %v1334_v13, %v1294_v58  ;;  %v1447_v35 = vmul.f32 %v3187_v15, %v1435_v38  ;;  %v1448_v14 = vmul.f32 %v3191_v36, %v1431_v3  ;;  %v1488_v43 = vpop.permute.xlu0 %1487 }
 0x588   :  { %v1409_v44 = vadd.f32 %v1401_v31, %v3115_v46  ;;  %v1410_v55 = vadd.f32 %v1402_v37, %v3117_v0  ;;  %v3508_v46 = vld [vmem:[#allocation26_spill] sm:$0xff] }
 0x589   :  { %v1455_v27 = vadd.f32 %v1447_v35, %v1407_v8  ;;  %v1456_v12 = vadd.f32 %v1448_v14, %v1408_v50  ;;  %v1496_v63 = vpop.permute.xlu1 %1495  ;;  %v3223_v25 = vadd.f32 %v1357_v4, %v1341_v54  ;;  %v3225_v10 = vadd.f32 %v1358_v29, %v1342_v52 }
 0x58a   :  { %v1503_v47 = vsel %vm441_vm2, %v1488_v43, %v1496_v63  ;;  %v1507_v30 = vsel %vm441_vm2, %v1496_v63, %v1488_v43  ;;  %v1385_v0 = vsel %vm441_vm2, %v3508_v46, %v2995_v6  ;;  %v1389_v60 = vsel %vm441_vm2, %v2995_v6, %v3508_v46  ;;  %v3510_v63 = vld [vmem:[#allocation23_spill] sm:$0xff] }
 0x58b   :  { %v1479_v4 = vadd.f32 %v1471_v18, %v1455_v27  ;;  %v1519_v29 = vmul.f32 %v3219_v7, %v1503_v47  ;;  %v1520_v2 = vmul.f32 %v3221_v24, %v1507_v30  ;;  %v1418_v1 = vpop.permute.xlu0 %1417  ;;  %v1480_v23 = vadd.f32 %v1472_v33, %v1456_v12  ;;  %v3509_v27 = vld [vmem:[#allocation24_spill] sm:$0xff] }
 0x58c   :  { %v1403_v8 = vmul.f32 %v3135_v48, %v1385_v0  ;;  %v1404_v50 = vmul.f32 %v3139_v41, %v1389_v60  ;;  %v1475_v12 = vmul.f32 %v3199_v42, %v3509_v27  ;;  %v1476_v56 = vmul.f32 %v3203_v45, %v3510_v63 }
 0x58d   :  { %v1527_v28 = vadd.f32 %v1519_v29, %v1479_v4  ;;  %v1426_v49 = vpop.permute.xlu1 %1425  ;;  %v1528_v11 = vadd.f32 %v1520_v2, %v1480_v23  ;;  %v3511_v4 = vld [vmem:[#allocation22_spill] sm:$0xff] }
 0x58e   :  { %v1432_v40 = vsel %vm376_vm1, %v1418_v1, %v1426_v49  ;;  %v1436_v5 = vsel %vm376_vm1, %v1426_v49, %v1418_v1  ;;  %v1411_v35 = vadd.f32 %v1403_v8, %v3177_v32  ;;  %v1412_v14 = vadd.f32 %v1404_v50, %v3179_v53  ;;  %v3512_v32 = vld [vmem:[#allocation37_spill] sm:$0xff] }
 0x58f   :  { %v1449_v51 = vmul.f32 %v3187_v15, %v1436_v5  ;;  %v1450_v26 = vmul.f32 %v3191_v36, %v1432_v40  ;;  %1663 = vmatprep.mubr.f32.mxu1 %v1528_v11  ;;  %v1490_v57 = vpop.permute.xlu0 %1489  ;;  %v1386_v53 = vsel %vm441_vm2, %v3512_v32, %v3511_v4  ;;  %v1390_v29 = vsel %vm441_vm2, %v3511_v4, %v3512_v32 }
 0x590   :  { %1664 = vmatmul.mubr.f32.vlgmr.msra.gmra.mxu1 %v1527_v28  ;;  %v1405_v11 = vmul.f32 %v3135_v48, %v1386_v53  ;;  %v1406_v40 = vmul.f32 %v3139_v41, %v1390_v29  ;;  %v3513_v48 = vld [vmem:[#allocation41_spill] sm:$0xff] }
 0x591   :  { %v1457_v19 = vadd.f32 %v1449_v51, %v1409_v44  ;;  %v1458_v9 = vadd.f32 %v1450_v26, %v1410_v55  ;;  %v1498_v16 = vpop.permute.xlu1 %1497  ;;  %v1477_v41 = vmul.f32 %v3199_v42, %v3513_v48 }
 0x592   :  { %v1504_v34 = vsel %vm441_vm2, %v1490_v57, %v1498_v16  ;;  %v1508_v61 = vsel %vm441_vm2, %v1498_v16, %v1490_v57  ;;  %v1413_v57 = vadd.f32 %v1405_v11, %v3223_v25 }
 0x593   :  { %v1521_v59 = vmul.f32 %v3219_v7, %v1504_v34  ;;  %v1522_v13 = vmul.f32 %v3221_v24, %v1508_v61  ;;  %v1420_v39 = vpop.permute.xlu0 %1419  ;;  %v1482_v58 = vadd.f32 %v1474_v17, %v1458_v9  ;;  %v1481_v21 = vadd.f32 %v1473_v22, %v1457_v19  ;;  %v3514_v9 = vld [vmem:[#allocation25_spill] sm:$0xff] }
 0x594   :  { %v1414_v22 = vadd.f32 %v1406_v40, %v3225_v10  ;;  %v1478_v16 = vmul.f32 %v3203_v45, %v3514_v9 }
 0x595   :  { %v1428_v3 = vpop.permute.xlu1 %1427  ;;  %v1530_v38 = vadd.f32 %v1522_v13, %v1482_v58  ;;  %v1529_v6 = vadd.f32 %v1521_v59, %v1481_v21 }
 0x596   :  { %v1433_v54 = vsel %vm376_vm1, %v1420_v39, %v1428_v3  ;;  %v1437_v52 = vsel %vm376_vm1, %v1428_v3, %v1420_v39 }
 0x597   :  { %v1451_v43 = vmul.f32 %v3187_v15, %v1437_v52  ;;  %v1452_v18 = vmul.f32 %v3191_v36, %v1433_v54  ;;  %1669 = vmatprep.mubr.f32.mxu1 %v1530_v38  ;;  %v1492_v33 = vpop.permute.xlu0 %1491 }
 0x598   :  { %1670 = vmatmul.mubr.f32.gmra.mxu1 %v1529_v6 }
 0x599   :  { %v1459_v62 = vadd.f32 %v1451_v43, %v1411_v35  ;;  %v1460_v47 = vadd.f32 %v1452_v18, %v1412_v14  ;;  %v1500_v30 = vpop.permute.xlu1 %1499 }
 0x59a   :  { %v1505_v2 = vsel %vm441_vm2, %v1492_v33, %v1500_v30  ;;  %v1509_v1 = vsel %vm441_vm2, %v1500_v30, %v1492_v33 }
 0x59b   :  { %v1523_v23 = vmul.f32 %v3219_v7, %v1505_v2  ;;  %v1524_v31 = vmul.f32 %v3221_v24, %v1509_v1  ;;  %v1422_v37 = vpop.permute.xlu0 %1421  ;;  %v1484_v28 = vadd.f32 %v1476_v56, %v1460_v47  ;;  %v1483_v49 = vadd.f32 %v1475_v12, %v1459_v62 }
 0x59d   :  { %v1430_v5 = vpop.permute.xlu1 %1429  ;;  %v1532_v44 = vadd.f32 %v1524_v31, %v1484_v28  ;;  %v1531_v55 = vadd.f32 %v1523_v23, %v1483_v49 }
 0x59e   :  { %v1434_v51 = vsel %vm376_vm1, %v1422_v37, %v1430_v5  ;;  %v1438_v26 = vsel %vm376_vm1, %v1430_v5, %v1422_v37 }
 0x59f   :  { %v1453_v17 = vmul.f32 %v3187_v15, %v1438_v26  ;;  %v1454_v19 = vmul.f32 %v3191_v36, %v1434_v51  ;;  %1675 = vmatprep.mubr.f32.mxu1 %v1532_v44  ;;  %v1494_v60 = vpop.permute.xlu0 %1493 }
 0x5a0   :  { %1676 = vmatmul.mubr.f32.gmra.mxu1 %v1531_v55 }
 0x5a1   :  { %v1461_v46 = vadd.f32 %v1453_v17, %v1413_v57  ;;  %v1462_v0 = vadd.f32 %v1454_v19, %v1414_v22  ;;  %v1502_v34 = vpop.permute.xlu1 %1501 }
 0x5a2   :  { %v1506_v25 = vsel %vm441_vm2, %v1494_v60, %v1502_v34  ;;  %v1510_v15 = vsel %vm441_vm2, %v1502_v34, %v1494_v60 }
 0x5a3   :  { %v1525_v36 = vmul.f32 %v3219_v7, %v1506_v25  ;;  %v1526_v10 = vmul.f32 %v3221_v24, %v1510_v15  ;;  %v1486_v61 = vadd.f32 %v1478_v16, %v1462_v0  ;;  %v1485_v59 = vadd.f32 %v1477_v41, %v1461_v46 }
 0x5a5   :  { %v1534_v42 = vadd.f32 %v1526_v10, %v1486_v61  ;;  %v1533_v13 = vadd.f32 %v1525_v36, %v1485_v59 }
 0x5a7   :  { %1681 = vmatprep.mubr.f32.mxu1 %v1534_v42 }
 0x5a8   :  { %1682 = vmatmul.mubr.f32.gmra.mxu1 %v1533_v13 }
 0x650   :  { %v3317_v45 = vpop.f32.mrf.mxu1 }
 0x651   :  { %v1731_v3 = vmul.f32 %v3317_v45, %v3317_v45 }
 0x652   :  { %v3319_v39 = vpop.f32.mrf.mxu1 }
 0x653   :  { %v1732_v54 = vmul.f32 %v3319_v39, %v3319_v39 }
 0x658   :  { %v3321_v58 = vpop.f32.mrf.mxu1 }
 0x659   :  { %v1733_v7 = vmul.f32 %v3321_v58, %v3321_v58  ;;  %v1688_v38 = vadd.f32 %v3321_v58, %v3317_v45 }
 0x65a   :  { %v3323_v21 = vpop.f32.mrf.mxu1 }
 0x65b   :  { %v1734_v50 = vmul.f32 %v3323_v21, %v3323_v21  ;;  %v1739_v35 = vadd.f32 %v1733_v7, %v1731_v3  ;;  %v1697_v14 = vadd.f32 %v3323_v21, %v3319_v39 }
 0x65d   :  { %v1748_v18 = vadd.f32 %v1734_v50, %v1732_v54 }
 0x660   :  { %v3325_v8 = vpop.f32.mrf.mxu1 }
 0x661   :  { %v1735_v6 = vmul.f32 %v3325_v8, %v3325_v8  ;;  %v1689_v43 = vadd.f32 %v1688_v38, %v3325_v8 }
 0x662   :  { %v3329_v24 = vpop.f32.mrf.mxu1 }
 0x663   :  { %v1736_v52 = vmul.f32 %v3329_v24, %v3329_v24  ;;  %v1740_v27 = vadd.f32 %v1739_v35, %v1735_v6  ;;  %v1698_v12 = vadd.f32 %v1697_v14, %v3329_v24 }
 0x665   :  { %v1749_v62 = vadd.f32 %v1748_v18, %v1736_v52 }
 0x668   :  { %v3346_v33 = vpop.f32.mrf.mxu1 }
 0x669   :  { %v1690_v63 = vadd.f32 %v1689_v43, %v3346_v33  ;;  %v1737_v56 = vmul.f32 %v3346_v33, %v3346_v33 }
 0x66a   :  { %v3352_v47 = vpop.f32.mrf.mxu1 }
 0x66b   :  { %v1691_v30 = vrot.slane %v1690_v63, 4  ;;  %v1741_v4 = vadd.f32 %v1740_v27, %v1737_v56  ;;  %v1699_v32 = vadd.f32 %v1698_v12, %v3352_v47  ;;  %v1738_v53 = vmul.f32 %v3352_v47, %v3352_v47 }
 0x66d   :  { %v1692_v29 = vadd.f32 %v1691_v30, %v1690_v63  ;;  %v1742_v2 = vrot.slane %v1741_v4, 4  ;;  %v1700_v1 = vrot.slane %v1699_v32, 4  ;;  %v1750_v23 = vadd.f32 %v1749_v62, %v1738_v53 }
 0x66f   :  { %v1693_v31 = vrot.slane %v1692_v29, 2  ;;  %v1743_v37 = vadd.f32 %v1742_v2, %v1741_v4  ;;  %v1701_v28 = vadd.f32 %v1700_v1, %v1699_v32  ;;  %v1751_v49 = vrot.slane %v1750_v23, 4 }
 0x671   :  { %v1702_v11 = vrot.slane %v1701_v28, 2  ;;  %v1752_v40 = vadd.f32 %v1751_v49, %v1750_v23  ;;  %v1694_v5 = vadd.f32 %v1693_v31, %v1692_v29  ;;  %v1744_v44 = vrot.slane %v1743_v37, 2 }
 0x673   :  { %v1703_v55 = vadd.f32 %v1702_v11, %v1701_v28  ;;  %v1753_v51 = vrot.slane %v1752_v40, 2  ;;  %v1695_v26 = vrot.slane %v1694_v5, 1  ;;  %v1745_v57 = vadd.f32 %v1744_v44, %v1743_v37 }
 0x675   :  { %v1696_v22 = vadd.f32 %v1695_v26, %v1694_v5  ;;  %v1704_v17 = vrot.slane %v1703_v55, 1  ;;  %v1746_v19 = vrot.slane %v1745_v57, 1  ;;  %v1754_v48 = vadd.f32 %v1753_v51, %v1752_v40 }
 0x676   :  { %v1788_v26 = vstv %s3412_s0  ;;  %s2030_s0 = scalar_lea.vmem %s1828_s22, 1024 }
 0x677   :  { %1706 = vrot.lane.b32.xlu0 %v1696_v22, %s2066_s18  ;;  %v1705_v41 = vadd.f32 %v1704_v17, %v1703_v55  ;;  %v1755_v9 = vrot.slane %v1754_v48, 1  ;;  %v1747_v16 = vadd.f32 %v1746_v19, %v1745_v57  ;;  %v3515_v55 = vld [vmem:[#allocation35_spill] sm:$0xff]  ;;  %p2031_p7 = scmp.ne.s32.totalorder %s1828_s22, %s2030_s0  ;;  %p2036_p9 = scmp.lt.s32.totalorder %s2030_s0, %s2030_s0 }
 0x679   :  { %1708 = vrot.lane.b32.xlu1 %v1705_v41, %s2066_s18  ;;  %v1756_v46 = vadd.f32 %v1755_v9, %v1754_v48  ;;  %p2037_p10 = por %p2036_p9, %p2035_p8 }
 0x67b   :  { %1757 = vrot.lane.b32.xlu0 %v1747_v16, %s2066_s18  ;;  %p2038_p11 = pnand %p2037_p10, %p2031_p7 }
 0x67d   :  { %1759 = vrot.lane.b32.xlu1 %v1756_v46, %s2066_s18 }
 0x6e9   :  { %v1707_v0 = vpop.permute.xlu0 %1706 }
 0x6eb   :  { %v1709_v60 = vpop.permute.xlu1 %1708 }
 0x6ec   :  { %v1710_v34 = vsel %vm376_vm1, %v1707_v0, %v1709_v60  ;;  %v1711_v25 = vsel %vm376_vm1, %v1709_v60, %v1707_v0 }
 0x6ed   :  { %v1712_v15 = vadd.f32 %v1711_v25, %v1696_v22  ;;  %v1713_v36 = vadd.f32 %v1710_v34, %v1705_v41  ;;  %v1758_v10 = vpop.permute.xlu0 %1757 }
 0x6ef   :  { %1714 = vrot.lane.b32.xlu0 %v1712_v15, %s2073_s7  ;;  %1716 = vrot.lane.b32.xlu1 %v1713_v36, %s2073_s7  ;;  %v1760_v61 = vpop.permute.xlu1 %1759 }
 0x6f0   :  { %v1761_v59 = vsel %vm376_vm1, %v1758_v10, %v1760_v61  ;;  %v1762_v42 = vsel %vm376_vm1, %v1760_v61, %v1758_v10 }
 0x6f1   :  { %v1763_v13 = vadd.f32 %v1762_v42, %v1747_v16  ;;  %v1764_v7 = vadd.f32 %v1761_v59, %v1756_v46 }
 0x6f3   :  { %1765 = vrot.lane.b32.xlu0 %v1763_v13, %s2073_s7  ;;  %1767 = vrot.lane.b32.xlu1 %v1764_v7, %s2073_s7 }
 0x761   :  { %v1715_v50 = vpop.permute.xlu0 %1714  ;;  %v1717_v3 = vpop.permute.xlu1 %1716 }
 0x762   :  { %v1718_v38 = vsel %vm897_vm3, %v1715_v50, %v1717_v3  ;;  %v1719_v6 = vsel %vm897_vm3, %v1717_v3, %v1715_v50 }
 0x763   :  { %v1720_v54 = vadd.f32 %v1719_v6, %v1712_v15  ;;  %v1721_v52 = vadd.f32 %v1718_v38, %v1713_v36 }
 0x765   :  { %v1766_v35 = vpop.permute.xlu0 %1765  ;;  %1722 = vrot.lane.b32.xlu0 %v1720_v54, %s2074_s19  ;;  %1724 = vrot.lane.b32.xlu1 %v1721_v52, %s2074_s19  ;;  %v1768_v14 = vpop.permute.xlu1 %1767 }
 0x766   :  { %v1769_v43 = vsel %vm897_vm3, %v1766_v35, %v1768_v14  ;;  %v1770_v18 = vsel %vm897_vm3, %v1768_v14, %v1766_v35 }
 0x767   :  { %v1771_v27 = vadd.f32 %v1770_v18, %v1763_v13  ;;  %v1772_v12 = vadd.f32 %v1769_v43, %v1764_v7 }
 0x769   :  { %1773 = vrot.lane.b32.xlu0 %v1771_v27, %s2074_s19  ;;  %1775 = vrot.lane.b32.xlu1 %v1772_v12, %s2074_s19 }
 0x7d7   :  { %v1723_v63 = vpop.permute.xlu0 %1722  ;;  %v1725_v56 = vpop.permute.xlu1 %1724 }
 0x7d8   :  { %v1726_v62 = vsel %vm906_vm4, %v1723_v63, %v1725_v56  ;;  %v1727_v30 = vsel %vm906_vm4, %v1725_v56, %v1723_v63 }
 0x7d9   :  { %v1728_v4 = vadd.f32 %v1727_v30, %v1720_v54  ;;  %v1729_v32 = vadd.f32 %v1726_v62, %v1721_v52 }
 0x7db   :  { %v1730_v53 = vadd.f32 %v1729_v32, %v1728_v4  ;;  %v1774_v29 = vpop.permute.xlu0 %1773  ;;  %v1776_v2 = vpop.permute.xlu1 %1775 }
 0x7dc   :  { %v1777_v1 = vsel %vm906_vm4, %v1774_v29, %v1776_v2  ;;  %v1778_v23 = vsel %vm906_vm4, %v1776_v2, %v1774_v29 }
 0x7dd   :  { %v1782_v31 = vmul.f32 0.001953125, %v1730_v53  ;;  %v1779_v37 = vadd.f32 %v1778_v23, %v1771_v27  ;;  %v1780_v28 = vadd.f32 %v1777_v1, %v1772_v12 }
 0x7df   :  { %v1781_v49 = vadd.f32 %v1780_v28, %v1779_v37  ;;  %v1784_v11 = vmul.f32 %v1782_v31, %v1782_v31  ;;  %v1793_v51 = vrot.slane %v1782_v31, %v3515_v55 }
 0x7e1   :  { %v1783_v40 = vmul.f32 0.001953125, %v1781_v49  ;;  %v1794_v20 = vsub.f32 %v3317_v45, %v1793_v51  ;;  %v1795_v19 = vsub.f32 %v3319_v39, %v1793_v51  ;;  %v1796_v48 = vsub.f32 %v3321_v58, %v1793_v51 }
 0x7e2   :  { %v1797_v41 = vsub.f32 %v3323_v21, %v1793_v51  ;;  %v1798_v9 = vsub.f32 %v3325_v8, %v1793_v51  ;;  %v1799_v16 = vsub.f32 %v3329_v24, %v1793_v51  ;;  %v1800_v46 = vsub.f32 %v3346_v33, %v1793_v51 }
 0x7e3   :  { %v1785_v5 = vsub.f32 %v1783_v40, %v1784_v11  ;;  %v1801_v0 = vsub.f32 %v3352_v47, %v1793_v51 }
 0x7e5   :  { %v1786_v44 = vadd.f32 1e-05, %v1785_v5 }
 0x7e7   :  { %1880 = vrsqrt.f32 %v1786_v44 }
 0x7f4   :  { %v1881_v57 = vpop.eup %1880 }
 0x7f5   :  { %v1789_v22 = vmul.f32 %v1881_v57, %v1788_v26 }
 0x7f7   :  { %v1805_v17 = vrot.slane %v1789_v22, %v3515_v55 }
 0x7f9   :  { %v1806_v60 = vmul.f32 %v1805_v17, %v1794_v20  ;;  %v1807_v45 = vmul.f32 %v1805_v17, %v1795_v19  ;;  %v1808_v34 = vmul.f32 %v1805_v17, %v1796_v48  ;;  %v1809_v25 = vmul.f32 %v1805_v17, %v1797_v41 }
 0x7fa   :  { %v1810_v15 = vmul.f32 %v1805_v17, %v1798_v9  ;;  %v1811_v39 = vmul.f32 %v1805_v17, %v1799_v16  ;;  %v1812_v36 = vmul.f32 %v1805_v17, %v1800_v46  ;;  %v1813_v58 = vmul.f32 %v1805_v17, %v1801_v0 }
 0x7fb   :  { %1814 = vst [vmem:[#allocation15] sm:$0xff] %v1806_v60  ;;  %1815 = vst [vmem:[#allocation15 + $0x8] sm:$0xff] %v1807_v45 }
 0x7fc   :  { %1816 = vst [vmem:[#allocation15 + $0x10] sm:$0xff] %v1808_v34  ;;  %1817 = vst [vmem:[#allocation15 + $0x18] sm:$0xff] %v1809_v25 }
 0x7fd   :  { %1818 = vst [vmem:[#allocation15 + $0x20] sm:$0xff] %v1810_v15  ;;  %1819 = vst [vmem:[#allocation15 + $0x28] sm:$0xff] %v1811_v39 }
 0x7fe   :  { %1820 = vst [vmem:[#allocation15 + $0x30] sm:$0xff] %v1812_v36  ;;  %1821 = vst [vmem:[#allocation15 + $0x38] sm:$0xff] %v1813_v58 }
 0x7ff   :  { %2041 = shalt.err (!%p2038_p11)
}
 0x800   :  { %1833 = dma.vmem_to_hbm [thread:$0]  %s1828_s22, 1024, %s3420_s8, [#allocation5], %s2065_s17, %s2065_s17, %s2066_s18  }
 0x801   :  { %2058 = dma.done.wait [#allocation5], 1024  }
 0x802   :  { %2059 = vsyncadd [#allocation5], 4294966272 }
 0x803   :  { %1837 = vsyncpa [#allocation4], 1 }
 0x804   :  { %1838 = vsyncpa [#allocation7], 1 }
 0x805   :  { %1839 = vsyncpa [#allocation10], 1 }
 0x806   :  { %1840 = vsyncpa [#allocation13], 1 }
 0x807   :  { %1841 = vsyncpa [#allocation5], 1 }

</bundles_post_ra>
